<compile_context>
chip_gen: v7x
topology: tpu7x:2x2x1
jax: 0.10.0
libtpu: 0.0.40
codegen_flags: <defaults>
</compile_context>

<pallas_src>
import functools

import jax
import jax.numpy as jnp
from jax.experimental import pallas as pl
from jax.experimental.pallas import tpu as pltpu

INPUT_CH = 3
INPUT_CH_VIEWS = 3
HIDDEN = 64
GEO_FEAT = 15


def _nerf_small_kernel(x_ref,
                       w1, b1, w2, b2, w3, b3,                      # sigma net (w3/b3 rows: geo 0..14, sigma 15)
                       cw1v, cw1g, cb1, cw2, cb2, cw3, cb3, cw4, cb4,  # color net (cw1 split: views / geo zero-padded)
                       out_ref, *, bf16_epilogue):
    eps = jnp.bfloat16 if bf16_epilogue else jnp.float32
    x = x_ref[...]                                   # (6, TN) f32; rows 0..2 = pts, 3..5 = views

    def hidden(w, b, h):
        # bf16 MXU dot (f32 accumulation in hardware); bias + ReLU epilogue in eps dtype.
        y = jnp.dot(w[...], h.astype(jnp.bfloat16), preferred_element_type=eps)
        return jnp.maximum(y + b[...], 0.0)

    # ---- sigma net ----
    # layer 0 (K=3): VPU broadcast-FMA in f32 (raw-input precision).
    # TODO(synk): evaluate moving this (and the views FMA below) onto the MXU from a bundle dump.
    h = (w1[:, 0:1] * x[0:1, :]
         + w1[:, 1:2] * x[1:2, :]
         + w1[:, 2:3] * x[2:3, :])
    h = jnp.maximum(h.astype(eps) + b1[...], 0.0)                    # (64, TN)
    # layer 1 (64 -> 64): bf16 MXU
    h = hidden(w2, b2, h)                                            # (64, TN)
    # layer 2 (64 -> 16): f32 output (sigma is read from it); rows: geo 0..14, sigma 15
    h = jnp.dot(w3[...], h.astype(jnp.bfloat16),
                preferred_element_type=jnp.float32) + b3[...]        # (16, TN) f32
    sigma = h[GEO_FEAT:GEO_FEAT + 1, :]                              # (1, TN)

    # ---- color net ----
    # layer 0: views part (K=3) on the VPU + geo part on the MXU.  cw1g has a zero
    # column at position 15, so the full 16-row `h` feeds the dot (sigma row adds 0)
    # -- no concat, no offset slice.
    cv = (cw1v[:, 0:1] * x[3:4, :]
          + cw1v[:, 1:2] * x[4:5, :]
          + cw1v[:, 2:3] * x[5:6, :])                                # (64, TN) f32
    cg = jnp.dot(cw1g[...], h.astype(jnp.bfloat16),
                 preferred_element_type=jnp.float32)                 # (64, TN) f32
    c = jnp.maximum((cv + cg).astype(eps) + cb1[...], 0.0)
    c = hidden(cw2, cb2, c)
    c = hidden(cw3, cb3, c)
    color = jnp.dot(cw4[...], c.astype(jnp.bfloat16),
                    preferred_element_type=jnp.float32) + cb4[...]   # (3, TN) f32

    # output rows 0..2 = color, row 3 = sigma; lane-dense, full-lane stores.
    out_ref[0:INPUT_CH, :] = color
    out_ref[INPUT_CH:INPUT_CH + 1, :] = sigma


def _prepare_params(params, bf16_epilogue):
    """Transpose / reorder / cast params once (outside the kernel).

    * All weights go to [out, in]; biases to [out, 1] columns (lane-broadcast in kernel).
    * w3/b3 rows reordered: geo -> 0..14, sigma -> 15.
    * cw1 split into a views part (64,3, f32, VPU path) and a geo part padded with a zero
      column to (64,16) so it consumes the full 16-row sigma-net output.
    * MXU weights cast to bf16; hidden-layer biases in the epilogue dtype (bf16 on
      v6e/v7x, f32 on v5e); output-layer biases stay f32.
    """
    f32, bf16 = jnp.float32, jnp.bfloat16
    eps = bf16 if bf16_epilogue else f32

    def t(w):           # [in, out] -> [out, in]
        return w.T

    def col(b):         # [1, out] -> [out, 1]
        return b.reshape(-1, 1)

    w3t = t(params["w3"])                                             # (16, 64), row 0 = sigma
    w3t_r = jnp.concatenate([w3t[1:], w3t[0:1]], axis=0)              # geo rows first, sigma last
    b3t = col(params["b3"])
    b3t_r = jnp.concatenate([b3t[1:], b3t[0:1]], axis=0)

    cw1t = t(params["cw1"])                                           # (64, 18)
    cw1v = cw1t[:, :INPUT_CH_VIEWS]                                   # (64, 3)
    cw1g = jnp.concatenate(
        [cw1t[:, INPUT_CH_VIEWS:], jnp.zeros((HIDDEN, 1), cw1t.dtype)], axis=1)  # (64, 16)

    return [
        t(params["w1"]).astype(f32), col(params["b1"]).astype(eps),
        t(params["w2"]).astype(bf16), col(params["b2"]).astype(eps),
        w3t_r.astype(bf16), b3t_r.astype(f32),
        cw1v.astype(f32), cw1g.astype(bf16), col(params["cb1"]).astype(eps),
        t(params["cw2"]).astype(bf16), col(params["cb2"]).astype(eps),
        t(params["cw3"]).astype(bf16), col(params["cb3"]).astype(eps),
        t(params["cw4"]).astype(bf16), col(params["cb4"]).astype(f32),
    ]


def _round_up(v, m):
    return ((v + m - 1) // m) * m


def _has_bf16_valu():
    """bf16 VALU exists on TPU v6e and newer; not on v2-v5 generations."""
    try:
        kind = jax.devices()[0].device_kind.lower()
    except Exception:
        return False
    if "tpu" not in kind and not kind.startswith("v"):
        return False
    for old in ("v2", "v3", "v4", "v5"):
        if old in kind:
            return False
    return True


@functools.partial(jax.jit, static_argnames=("tile_n", "bf16_epilogue"))
def _forward_impl(x, params, tile_n, bf16_epilogue):
    n, c = x.shape
    assert c == INPUT_CH + INPUT_CH_VIEWS
    xt = x.astype(jnp.float32).T                             # (6, N): lane-dense over points
    param_list = _prepare_params(params, bf16_epilogue)

    in_specs = [pl.BlockSpec((c, tile_n), lambda i: (0, i))]
    # Weights/biases: whole array, constant block index -> fetched once, VMEM-resident.
    in_specs += [pl.BlockSpec(p.shape, lambda i: (0, 0)) for p in param_list]

    out = pl.pallas_call(
        functools.partial(_nerf_small_kernel, bf16_epilogue=bf16_epilogue),
        out_shape=jax.ShapeDtypeStruct((4, n), jnp.float32),
        grid_spec=pltpu.PrefetchScalarGridSpec(
            num_scalar_prefetch=0,
            grid=(pl.cdiv(n, tile_n),),      # final partial block: Pallas masks the writeback
            in_specs=in_specs,
            out_specs=pl.BlockSpec((4, tile_n), lambda i: (0, i)),
        ),
        compiler_params=pltpu.CompilerParams(
            dimension_semantics=("parallel",),        # feeds both v7x TensorCores when grid >= 2
            vmem_limit_bytes=32 * 1024 * 1024,        # actual footprint ~10 MiB at tile_n=4096
        ),
    )(xt, *param_list)
    return out.T                                              # (N, 4)


def nerf_small_forward(x, params, tile_n=4096, bf16_epilogue=None):
    """x: [N, input_ch + input_ch_views] -> [N, 4] = concat(color(3), sigma(1)).

    tile_n: points per grid step (lane axis); sweep 4096-16384.  It is clamped so tiny N
    doesn't compute a mostly-empty tile while keeping >= 2 grid steps when possible
    (v7x has 2 TensorCores fed by the "parallel" grid axis).
    """
    n = x.shape[0]
    if bf16_epilogue is None:
        bf16_epilogue = _has_bf16_valu()
    tile_n = min(int(tile_n), _round_up(pl.cdiv(n, 2), 128))
    tile_n = max(128, _round_up(tile_n, 128))
    return _forward_impl(x, params, int(tile_n), bool(bf16_epilogue))


def init_params(key):
    """Deterministic synthetic init matching the PyTorch module's shapes.

    Weights are [in, out]; biases are [1, out].  The last sigma-net bias is the constant
    0.1 as in the PyTorch __init__.
    """
    ks = jax.random.split(key, 16)
    scale = 0.1

    def lin(k, i, o):
        return scale * jax.random.normal(k, (i, o), jnp.float32)

    return {
        # sigma net: 3 -> 64 -> 64 -> 16
        "w1": lin(ks[0], INPUT_CH, HIDDEN),
        "b1": scale * jax.random.normal(ks[1], (1, HIDDEN), jnp.float32),
        "w2": lin(ks[2], HIDDEN, HIDDEN),
        "b2": scale * jax.random.normal(ks[3], (1, HIDDEN), jnp.float32),
        "w3": lin(ks[4], HIDDEN, 1 + GEO_FEAT),
        "b3": jnp.full((1, 1 + GEO_FEAT), 0.1, jnp.float32),  # constant_(bias, 0.1)
        # color net: 18 -> 64 -> 64 -> 64 -> 3
        "cw1": lin(ks[5], INPUT_CH_VIEWS + GEO_FEAT, HIDDEN),
        "cb1": scale * jax.random.normal(ks[6], (1, HIDDEN), jnp.float32),
        "cw2": lin(ks[7], HIDDEN, HIDDEN),
        "cb2": scale * jax.random.normal(ks[8], (1, HIDDEN), jnp.float32),
        "cw3": lin(ks[9], HIDDEN, HIDDEN),
        "cb3": scale * jax.random.normal(ks[10], (1, HIDDEN), jnp.float32),
        "cw4": lin(ks[11], HIDDEN, 3),
        "cb4": scale * jax.random.normal(ks[12], (1, 3), jnp.float32),
    }


def reference_forward(x, p):
    """Pure-JAX f32 reference reproducing the PyTorch forward semantics."""
    x = x.astype(jnp.float32)
    pts, views = x[..., :INPUT_CH], x[..., INPUT_CH:INPUT_CH + INPUT_CH_VIEWS]
    h = jnp.maximum(pts @ p["w1"] + p["b1"], 0.0)
    h = jnp.maximum(h @ p["w2"] + p["b2"], 0.0)
    h = h @ p["w3"] + p["b3"]
    sigma, geo = h[..., 0], h[..., 1:]
    hc = jnp.concatenate([views, geo], axis=-1)
    c = jnp.maximum(hc @ p["cw1"] + p["cb1"], 0.0)
    c = jnp.maximum(c @ p["cw2"] + p["cb2"], 0.0)
    c = jnp.maximum(c @ p["cw3"] + p["cb3"], 0.0)
    color = c @ p["cw4"] + p["cb4"]
    return jnp.concatenate([color, sigma[..., None]], axis=-1)


if __name__ == "__main__":
    key = jax.random.PRNGKey(0)
    kx, kp = jax.random.split(key)

    # Small test shapes: N is neither a multiple of tile_n nor of 128, so the
    # pl.cdiv partial-final-block path and a multi-step grid (4 steps) are exercised.
    N = 1000
    x = jax.random.normal(kx, (N, INPUT_CH + INPUT_CH_VIEWS), jnp.float32)
    params = init_params(kp)

    out = nerf_small_forward(x, params, tile_n=256)
    out = jax.block_until_ready(out)

    ref = reference_forward(x, params)
    assert out.shape == (N, 4)
    # bf16 matmul inputs (and bf16 epilogues on v6e/v7x) with f32 accumulation:
    # compare against the pure-f32 reference with a slightly loose tolerance.
    assert jnp.allclose(out, ref, atol=2e-2, rtol=2e-2), "mismatch vs JAX reference"

    print("KERNEL_OK")
</pallas_src>

<mosaic_0001>
module attributes {stable_mosaic.version = 11 : i64} {
  func.func @_nerf_small_kernel(%arg0: i32, %arg1: memref<6x256xf32, #tpu.memory_space<vmem>>, %arg2: memref<64x3xf32, #tpu.memory_space<vmem>>, %arg3: memref<64x1xf32, #tpu.memory_space<vmem>>, %arg4: memref<64x64xbf16, #tpu.memory_space<vmem>>, %arg5: memref<64x1xf32, #tpu.memory_space<vmem>>, %arg6: memref<16x64xbf16, #tpu.memory_space<vmem>>, %arg7: memref<16x1xf32, #tpu.memory_space<vmem>>, %arg8: memref<64x3xf32, #tpu.memory_space<vmem>>, %arg9: memref<64x16xbf16, #tpu.memory_space<vmem>>, %arg10: memref<64x1xf32, #tpu.memory_space<vmem>>, %arg11: memref<64x64xbf16, #tpu.memory_space<vmem>>, %arg12: memref<64x1xf32, #tpu.memory_space<vmem>>, %arg13: memref<64x64xbf16, #tpu.memory_space<vmem>>, %arg14: memref<64x1xf32, #tpu.memory_space<vmem>>, %arg15: memref<3x64xbf16, #tpu.memory_space<vmem>>, %arg16: memref<3x1xf32, #tpu.memory_space<vmem>>, %arg17: memref<4x256xf32, #tpu.memory_space<vmem>>) attributes {dimension_semantics = [#tpu.dimension_semantics<parallel>], iteration_bounds = array<i64: 4>, scalar_prefetch = 0 : i64, scratch_operands = 0 : i64, tpu.core_type = #tpu.core_type<tc>, window_params = [{transform_indices = @transform_0, window_bounds = array<i64: 6, 256>}, {pipeline_mode = #tpu.pipeline_mode<synchronous>, transform_indices = @transform_1, window_bounds = array<i64: 64, 3>}, {pipeline_mode = #tpu.pipeline_mode<synchronous>, transform_indices = @transform_2, window_bounds = array<i64: 64, 1>}, {pipeline_mode = #tpu.pipeline_mode<synchronous>, transform_indices = @transform_3, window_bounds = array<i64: 64, 64>}, {pipeline_mode = #tpu.pipeline_mode<synchronous>, transform_indices = @transform_4, window_bounds = array<i64: 64, 1>}, {pipeline_mode = #tpu.pipeline_mode<synchronous>, transform_indices = @transform_5, window_bounds = array<i64: 16, 64>}, {pipeline_mode = #tpu.pipeline_mode<synchronous>, transform_indices = @transform_6, window_bounds = array<i64: 16, 1>}, {pipeline_mode = #tpu.pipeline_mode<synchronous>, transform_indices = @transform_7, window_bounds = array<i64: 64, 3>}, {pipeline_mode = #tpu.pipeline_mode<synchronous>, transform_indices = @transform_8, window_bounds = array<i64: 64, 16>}, {pipeline_mode = #tpu.pipeline_mode<synchronous>, transform_indices = @transform_9, window_bounds = array<i64: 64, 1>}, {pipeline_mode = #tpu.pipeline_mode<synchronous>, transform_indices = @transform_10, window_bounds = array<i64: 64, 64>}, {pipeline_mode = #tpu.pipeline_mode<synchronous>, transform_indices = @transform_11, window_bounds = array<i64: 64, 1>}, {pipeline_mode = #tpu.pipeline_mode<synchronous>, transform_indices = @transform_12, window_bounds = array<i64: 64, 64>}, {pipeline_mode = #tpu.pipeline_mode<synchronous>, transform_indices = @transform_13, window_bounds = array<i64: 64, 1>}, {pipeline_mode = #tpu.pipeline_mode<synchronous>, transform_indices = @transform_14, window_bounds = array<i64: 3, 64>}, {pipeline_mode = #tpu.pipeline_mode<synchronous>, transform_indices = @transform_15, window_bounds = array<i64: 3, 1>}, {transform_indices = @transform_16, window_bounds = array<i64: 4, 256>}]} {
    %c0 = arith.constant 0 : index
    %c0_0 = arith.constant 0 : index
    %0 = vector.load %arg1[%c0, %c0_0] : memref<6x256xf32, #tpu.memory_space<vmem>>, vector<6x256xf32>
    %c0_1 = arith.constant 0 : index
    %c0_2 = arith.constant 0 : index
    %1 = vector.load %arg2[%c0_1, %c0_2] : memref<64x3xf32, #tpu.memory_space<vmem>>, vector<64x1xf32>
    %2 = vector.extract_strided_slice %0 {offsets = [0, 0], sizes = [1, 256], strides = [1, 1]} : vector<6x256xf32> to vector<1x256xf32>
    %3 = vector.broadcast %1 : vector<64x1xf32> to vector<64x256xf32>
    %4 = vector.broadcast %2 : vector<1x256xf32> to vector<64x256xf32>
    %5 = arith.mulf %3, %4 : vector<64x256xf32>
    %c0_3 = arith.constant 0 : index
    %c1 = arith.constant 1 : index
    %6 = vector.load %arg2[%c0_3, %c1] : memref<64x3xf32, #tpu.memory_space<vmem>>, vector<64x1xf32>
    %7 = vector.extract_strided_slice %0 {offsets = [1, 0], sizes = [1, 256], strides = [1, 1]} : vector<6x256xf32> to vector<1x256xf32>
    %8 = vector.broadcast %6 : vector<64x1xf32> to vector<64x256xf32>
    %9 = vector.broadcast %7 : vector<1x256xf32> to vector<64x256xf32>
    %10 = arith.mulf %8, %9 : vector<64x256xf32>
    %11 = arith.addf %5, %10 : vector<64x256xf32>
    %c0_4 = arith.constant 0 : index
    %c2 = arith.constant 2 : index
    %12 = vector.load %arg2[%c0_4, %c2] : memref<64x3xf32, #tpu.memory_space<vmem>>, vector<64x1xf32>
    %13 = vector.extract_strided_slice %0 {offsets = [2, 0], sizes = [1, 256], strides = [1, 1]} : vector<6x256xf32> to vector<1x256xf32>
    %14 = vector.broadcast %12 : vector<64x1xf32> to vector<64x256xf32>
    %15 = vector.broadcast %13 : vector<1x256xf32> to vector<64x256xf32>
    %16 = arith.mulf %14, %15 : vector<64x256xf32>
    %17 = arith.addf %11, %16 : vector<64x256xf32>
    %c0_5 = arith.constant 0 : index
    %c0_6 = arith.constant 0 : index
    %18 = vector.load %arg3[%c0_5, %c0_6] : memref<64x1xf32, #tpu.memory_space<vmem>>, vector<64x1xf32>
    %19 = vector.broadcast %18 : vector<64x1xf32> to vector<64x256xf32>
    %20 = arith.addf %17, %19 : vector<64x256xf32>
    %cst = arith.constant 0.000000e+00 : f32
    %21 = vector.broadcast %cst : f32 to vector<64x256xf32>
    %22 = arith.maximumf %20, %21 : vector<64x256xf32>
    %c0_7 = arith.constant 0 : index
    %c0_8 = arith.constant 0 : index
    %23 = vector.load %arg4[%c0_7, %c0_8] : memref<64x64xbf16, #tpu.memory_space<vmem>>, vector<64x64xbf16>
    %24 = arith.truncf %22 : vector<64x256xf32> to vector<64x256xbf16>
    %cst_9 = arith.constant dense<0.000000e+00> : vector<64x256xf32>
    %25 = tpu.matmul %23, %24, %cst_9 {dimension_numbers = #tpu.dot_dimension_numbers<[1], [0], [0], [1], [0, 0, 1, 1], [], []>} : vector<64x64xbf16>, vector<64x256xbf16>, vector<64x256xf32> -> vector<64x256xf32>
    %c0_10 = arith.constant 0 : index
    %c0_11 = arith.constant 0 : index
    %26 = vector.load %arg5[%c0_10, %c0_11] : memref<64x1xf32, #tpu.memory_space<vmem>>, vector<64x1xf32>
    %27 = vector.broadcast %26 : vector<64x1xf32> to vector<64x256xf32>
    %28 = arith.addf %25, %27 : vector<64x256xf32>
    %cst_12 = arith.constant 0.000000e+00 : f32
    %29 = vector.broadcast %cst_12 : f32 to vector<64x256xf32>
    %30 = arith.maximumf %28, %29 : vector<64x256xf32>
    %c0_13 = arith.constant 0 : index
    %c0_14 = arith.constant 0 : index
    %31 = vector.load %arg6[%c0_13, %c0_14] : memref<16x64xbf16, #tpu.memory_space<vmem>>, vector<16x64xbf16>
    %32 = arith.truncf %30 : vector<64x256xf32> to vector<64x256xbf16>
    %cst_15 = arith.constant dense<0.000000e+00> : vector<16x256xf32>
    %33 = tpu.matmul %31, %32, %cst_15 {dimension_numbers = #tpu.dot_dimension_numbers<[1], [0], [0], [1], [0, 0, 1, 1], [], []>} : vector<16x64xbf16>, vector<64x256xbf16>, vector<16x256xf32> -> vector<16x256xf32>
    %c0_16 = arith.constant 0 : index
    %c0_17 = arith.constant 0 : index
    %34 = vector.load %arg7[%c0_16, %c0_17] : memref<16x1xf32, #tpu.memory_space<vmem>>, vector<16x1xf32>
    %35 = vector.broadcast %34 : vector<16x1xf32> to vector<16x256xf32>
    %36 = arith.addf %33, %35 : vector<16x256xf32>
    %37 = vector.extract_strided_slice %36 {offsets = [15, 0], sizes = [1, 256], strides = [1, 1]} : vector<16x256xf32> to vector<1x256xf32>
    %c0_18 = arith.constant 0 : index
    %c0_19 = arith.constant 0 : index
    %38 = vector.load %arg8[%c0_18, %c0_19] : memref<64x3xf32, #tpu.memory_space<vmem>>, vector<64x1xf32>
    %39 = vector.extract_strided_slice %0 {offsets = [3, 0], sizes = [1, 256], strides = [1, 1]} : vector<6x256xf32> to vector<1x256xf32>
    %40 = vector.broadcast %38 : vector<64x1xf32> to vector<64x256xf32>
    %41 = vector.broadcast %39 : vector<1x256xf32> to vector<64x256xf32>
    %42 = arith.mulf %40, %41 : vector<64x256xf32>
    %c0_20 = arith.constant 0 : index
    %c1_21 = arith.constant 1 : index
    %43 = vector.load %arg8[%c0_20, %c1_21] : memref<64x3xf32, #tpu.memory_space<vmem>>, vector<64x1xf32>
    %44 = vector.extract_strided_slice %0 {offsets = [4, 0], sizes = [1, 256], strides = [1, 1]} : vector<6x256xf32> to vector<1x256xf32>
    %45 = vector.broadcast %43 : vector<64x1xf32> to vector<64x256xf32>
    %46 = vector.broadcast %44 : vector<1x256xf32> to vector<64x256xf32>
    %47 = arith.mulf %45, %46 : vector<64x256xf32>
    %48 = arith.addf %42, %47 : vector<64x256xf32>
    %c0_22 = arith.constant 0 : index
    %c2_23 = arith.constant 2 : index
    %49 = vector.load %arg8[%c0_22, %c2_23] : memref<64x3xf32, #tpu.memory_space<vmem>>, vector<64x1xf32>
    %50 = vector.extract_strided_slice %0 {offsets = [5, 0], sizes = [1, 256], strides = [1, 1]} : vector<6x256xf32> to vector<1x256xf32>
    %51 = vector.broadcast %49 : vector<64x1xf32> to vector<64x256xf32>
    %52 = vector.broadcast %50 : vector<1x256xf32> to vector<64x256xf32>
    %53 = arith.mulf %51, %52 : vector<64x256xf32>
    %54 = arith.addf %48, %53 : vector<64x256xf32>
    %c0_24 = arith.constant 0 : index
    %c0_25 = arith.constant 0 : index
    %55 = vector.load %arg9[%c0_24, %c0_25] : memref<64x16xbf16, #tpu.memory_space<vmem>>, vector<64x16xbf16>
    %56 = arith.truncf %36 : vector<16x256xf32> to vector<16x256xbf16>
    %cst_26 = arith.constant dense<0.000000e+00> : vector<64x256xf32>
    %57 = tpu.matmul %55, %56, %cst_26 {dimension_numbers = #tpu.dot_dimension_numbers<[1], [0], [0], [1], [0, 0, 1, 1], [], []>} : vector<64x16xbf16>, vector<16x256xbf16>, vector<64x256xf32> -> vector<64x256xf32>
    %58 = arith.addf %54, %57 : vector<64x256xf32>
    %c0_27 = arith.constant 0 : index
    %c0_28 = arith.constant 0 : index
    %59 = vector.load %arg10[%c0_27, %c0_28] : memref<64x1xf32, #tpu.memory_space<vmem>>, vector<64x1xf32>
    %60 = vector.broadcast %59 : vector<64x1xf32> to vector<64x256xf32>
    %61 = arith.addf %58, %60 : vector<64x256xf32>
    %cst_29 = arith.constant 0.000000e+00 : f32
    %62 = vector.broadcast %cst_29 : f32 to vector<64x256xf32>
    %63 = arith.maximumf %61, %62 : vector<64x256xf32>
    %c0_30 = arith.constant 0 : index
    %c0_31 = arith.constant 0 : index
    %64 = vector.load %arg11[%c0_30, %c0_31] : memref<64x64xbf16, #tpu.memory_space<vmem>>, vector<64x64xbf16>
    %65 = arith.truncf %63 : vector<64x256xf32> to vector<64x256xbf16>
    %cst_32 = arith.constant dense<0.000000e+00> : vector<64x256xf32>
    %66 = tpu.matmul %64, %65, %cst_32 {dimension_numbers = #tpu.dot_dimension_numbers<[1], [0], [0], [1], [0, 0, 1, 1], [], []>} : vector<64x64xbf16>, vector<64x256xbf16>, vector<64x256xf32> -> vector<64x256xf32>
    %c0_33 = arith.constant 0 : index
    %c0_34 = arith.constant 0 : index
    %67 = vector.load %arg12[%c0_33, %c0_34] : memref<64x1xf32, #tpu.memory_space<vmem>>, vector<64x1xf32>
    %68 = vector.broadcast %67 : vector<64x1xf32> to vector<64x256xf32>
    %69 = arith.addf %66, %68 : vector<64x256xf32>
    %cst_35 = arith.constant 0.000000e+00 : f32
    %70 = vector.broadcast %cst_35 : f32 to vector<64x256xf32>
    %71 = arith.maximumf %69, %70 : vector<64x256xf32>
    %c0_36 = arith.constant 0 : index
    %c0_37 = arith.constant 0 : index
    %72 = vector.load %arg13[%c0_36, %c0_37] : memref<64x64xbf16, #tpu.memory_space<vmem>>, vector<64x64xbf16>
    %73 = arith.truncf %71 : vector<64x256xf32> to vector<64x256xbf16>
    %cst_38 = arith.constant dense<0.000000e+00> : vector<64x256xf32>
    %74 = tpu.matmul %72, %73, %cst_38 {dimension_numbers = #tpu.dot_dimension_numbers<[1], [0], [0], [1], [0, 0, 1, 1], [], []>} : vector<64x64xbf16>, vector<64x256xbf16>, vector<64x256xf32> -> vector<64x256xf32>
    %c0_39 = arith.constant 0 : index
    %c0_40 = arith.constant 0 : index
    %75 = vector.load %arg14[%c0_39, %c0_40] : memref<64x1xf32, #tpu.memory_space<vmem>>, vector<64x1xf32>
    %76 = vector.broadcast %75 : vector<64x1xf32> to vector<64x256xf32>
    %77 = arith.addf %74, %76 : vector<64x256xf32>
    %cst_41 = arith.constant 0.000000e+00 : f32
    %78 = vector.broadcast %cst_41 : f32 to vector<64x256xf32>
    %79 = arith.maximumf %77, %78 : vector<64x256xf32>
    %c0_42 = arith.constant 0 : index
    %c0_43 = arith.constant 0 : index
    %80 = vector.load %arg15[%c0_42, %c0_43] : memref<3x64xbf16, #tpu.memory_space<vmem>>, vector<3x64xbf16>
    %81 = arith.truncf %79 : vector<64x256xf32> to vector<64x256xbf16>
    %cst_44 = arith.constant dense<0.000000e+00> : vector<3x256xf32>
    %82 = tpu.matmul %80, %81, %cst_44 {dimension_numbers = #tpu.dot_dimension_numbers<[1], [0], [0], [1], [0, 0, 1, 1], [], []>} : vector<3x64xbf16>, vector<64x256xbf16>, vector<3x256xf32> -> vector<3x256xf32>
    %c0_45 = arith.constant 0 : index
    %c0_46 = arith.constant 0 : index
    %83 = vector.load %arg16[%c0_45, %c0_46] : memref<3x1xf32, #tpu.memory_space<vmem>>, vector<3x1xf32>
    %84 = vector.broadcast %83 : vector<3x1xf32> to vector<3x256xf32>
    %85 = arith.addf %82, %84 : vector<3x256xf32>
    %c0_47 = arith.constant 0 : index
    %c0_48 = arith.constant 0 : index
    %86 = vector.load %arg17[%c0_47, %c0_48] : memref<4x256xf32, #tpu.memory_space<vmem>>, vector<3x256xf32>
    tpu.vector_store %arg17[%c0_47, %c0_48], %85 {strides = array<i32>} : memref<4x256xf32, #tpu.memory_space<vmem>>, vector<3x256xf32>,
    %c3 = arith.constant 3 : index
    %c0_49 = arith.constant 0 : index
    %87 = vector.load %arg17[%c3, %c0_49] : memref<4x256xf32, #tpu.memory_space<vmem>>, vector<1x256xf32>
    tpu.vector_store %arg17[%c3, %c0_49], %37 {strides = array<i32>} : memref<4x256xf32, #tpu.memory_space<vmem>>, vector<1x256xf32>,
    return
  }
  func.func @transform_0(%arg0: i32) -> (i32, i32) {
    %c0_i32 = arith.constant 0 : i32
    %c0_i32_0 = arith.constant 0 : i32
    return %c0_i32, %arg0 : i32, i32
  }
  func.func @transform_1(%arg0: i32) -> (i32, i32) {
    %c0_i32 = arith.constant 0 : i32
    %c0_i32_0 = arith.constant 0 : i32
    %c0_i32_1 = arith.constant 0 : i32
    return %c0_i32, %c0_i32_0 : i32, i32
  }
  func.func @transform_2(%arg0: i32) -> (i32, i32) {
    %c0_i32 = arith.constant 0 : i32
    %c0_i32_0 = arith.constant 0 : i32
    %c0_i32_1 = arith.constant 0 : i32
    return %c0_i32, %c0_i32_0 : i32, i32
  }
  func.func @transform_3(%arg0: i32) -> (i32, i32) {
    %c0_i32 = arith.constant 0 : i32
    %c0_i32_0 = arith.constant 0 : i32
    %c0_i32_1 = arith.constant 0 : i32
    return %c0_i32, %c0_i32_0 : i32, i32
  }
  func.func @transform_4(%arg0: i32) -> (i32, i32) {
    %c0_i32 = arith.constant 0 : i32
    %c0_i32_0 = arith.constant 0 : i32
    %c0_i32_1 = arith.constant 0 : i32
    return %c0_i32, %c0_i32_0 : i32, i32
  }
  func.func @transform_5(%arg0: i32) -> (i32, i32) {
    %c0_i32 = arith.constant 0 : i32
    %c0_i32_0 = arith.constant 0 : i32
    %c0_i32_1 = arith.constant 0 : i32
    return %c0_i32, %c0_i32_0 : i32, i32
  }
  func.func @transform_6(%arg0: i32) -> (i32, i32) {
    %c0_i32 = arith.constant 0 : i32
    %c0_i32_0 = arith.constant 0 : i32
    %c0_i32_1 = arith.constant 0 : i32
    return %c0_i32, %c0_i32_0 : i32, i32
  }
  func.func @transform_7(%arg0: i32) -> (i32, i32) {
    %c0_i32 = arith.constant 0 : i32
    %c0_i32_0 = arith.constant 0 : i32
    %c0_i32_1 = arith.constant 0 : i32
    return %c0_i32, %c0_i32_0 : i32, i32
  }
  func.func @transform_8(%arg0: i32) -> (i32, i32) {
    %c0_i32 = arith.constant 0 : i32
    %c0_i32_0 = arith.constant 0 : i32
    %c0_i32_1 = arith.constant 0 : i32
    return %c0_i32, %c0_i32_0 : i32, i32
  }
  func.func @transform_9(%arg0: i32) -> (i32, i32) {
    %c0_i32 = arith.constant 0 : i32
    %c0_i32_0 = arith.constant 0 : i32
    %c0_i32_1 = arith.constant 0 : i32
    return %c0_i32, %c0_i32_0 : i32, i32
  }
  func.func @transform_10(%arg0: i32) -> (i32, i32) {
    %c0_i32 = arith.constant 0 : i32
    %c0_i32_0 = arith.constant 0 : i32
    %c0_i32_1 = arith.constant 0 : i32
    return %c0_i32, %c0_i32_0 : i32, i32
  }
  func.func @transform_11(%arg0: i32) -> (i32, i32) {
    %c0_i32 = arith.constant 0 : i32
    %c0_i32_0 = arith.constant 0 : i32
    %c0_i32_1 = arith.constant 0 : i32
    return %c0_i32, %c0_i32_0 : i32, i32
  }
  func.func @transform_12(%arg0: i32) -> (i32, i32) {
    %c0_i32 = arith.constant 0 : i32
    %c0_i32_0 = arith.constant 0 : i32
    %c0_i32_1 = arith.constant 0 : i32
    return %c0_i32, %c0_i32_0 : i32, i32
  }
  func.func @transform_13(%arg0: i32) -> (i32, i32) {
    %c0_i32 = arith.constant 0 : i32
    %c0_i32_0 = arith.constant 0 : i32
    %c0_i32_1 = arith.constant 0 : i32
    return %c0_i32, %c0_i32_0 : i32, i32
  }
  func.func @transform_14(%arg0: i32) -> (i32, i32) {
    %c0_i32 = arith.constant 0 : i32
    %c0_i32_0 = arith.constant 0 : i32
    %c0_i32_1 = arith.constant 0 : i32
    return %c0_i32, %c0_i32_0 : i32, i32
  }
  func.func @transform_15(%arg0: i32) -> (i32, i32) {
    %c0_i32 = arith.constant 0 : i32
    %c0_i32_0 = arith.constant 0 : i32
    %c0_i32_1 = arith.constant 0 : i32
    return %c0_i32, %c0_i32_0 : i32, i32
  }
  func.func @transform_16(%arg0: i32) -> (i32, i32) {
    %c0_i32 = arith.constant 0 : i32
    %c0_i32_0 = arith.constant 0 : i32
    return %c0_i32, %arg0 : i32, i32
  }
}

</mosaic_0001>

<bundles_post_ra>
// kernel: _forward_impl.1
= control target key start
LH: loop header
LB: loop body
LE: loop exit
PB: predicated region body
PF: predicated region fallthrough
CT: control target
= control target key end

     0   :  { %s2956_s0 = inlined_call_operand.vmem [shape: f32[6,1000], index: 0, kind: input, shape index: {}]   ;;  %s2957_s1 = inlined_call_operand.vmem [shape: f32[64,3], index: 1, kind: input, shape index: {}]   ;;  %s2958_s2 = inlined_call_operand.vmem [shape: f32[64,1], index: 2, kind: input, shape index: {}]   ;;  %s2959_s3 = inlined_call_operand.vmem [shape: bf16[64,64], index: 3, kind: input, shape index: {}]   ;;  %s2960_s4 = inlined_call_operand.vmem [shape: f32[64,1], index: 4, kind: input, shape index: {}]   ;;  %s2961_s5 = inlined_call_operand.vmem [shape: bf16[16,64], index: 5, kind: input, shape index: {}]   ;;  %s2962_s6 = inlined_call_operand.vmem [shape: f32[16,1], index: 6, kind: input, shape index: {}]   ;;  %s2963_s7 = inlined_call_operand.vmem [shape: f32[64,3], index: 7, kind: input, shape index: {}]   ;;  %s2964_s8 = inlined_call_operand.vmem [shape: bf16[64,16], index: 8, kind: input, shape index: {}]   ;;  %s2965_s9 = inlined_call_operand.vmem [shape: f32[64,1], index: 9, kind: input, shape index: {}]   ;;  %s2966_s10 = inlined_call_operand.vmem [shape: bf16[64,64], index: 10, kind: input, shape index: {}]   ;;  %s2967_s11 = inlined_call_operand.vmem [shape: f32[64,1], index: 11, kind: input, shape index: {}]   ;;  %s2968_s12 = inlined_call_operand.vmem [shape: bf16[64,64], index: 12, kind: input, shape index: {}]   ;;  %s2969_s13 = inlined_call_operand.vmem [shape: f32[64,1], index: 13, kind: input, shape index: {}]   ;;  %s2970_s14 = inlined_call_operand.vmem [shape: bf16[3,64], index: 14, kind: input, shape index: {}]   ;;  %s2971_s15 = inlined_call_operand.vmem [shape: f32[3,1], index: 15, kind: input, shape index: {}]   ;;  %s2972_s16 = inlined_call_operand.hbm [shape: f32[4,1000], index: 16, kind: output, shape index: {}]  }
   0x1   :  { %2974 = sst [smem:[#allocation7_spill]] %s2956_s0 }
   0x2   :  { %2975 = sst [smem:[#allocation8_spill]] %s2957_s1 }
   0x3   :  { %2976 = sst [smem:[#allocation9_spill]] %s2958_s2 }
   0x4   :  { %2977 = sst [smem:[#allocation10_spill]] %s2959_s3 }
   0x5   :  { %21 = vsyncpa [#allocation3], 0 }
   0x6   :  { %23 = vsyncpa [#allocation3 + $0x1], 0  ;;  %s2338_s21 = smov 0   ;;  %s2340_s22 = smov 0  }
   0x7   :  { %s2342_s23 = smov 0   ;;  %s2344_s24 = smov 0  }
   0x8 LB: > { %2978 = sst [smem:[#allocation5_spill]] %s2242_s23  ;;  %s2359_s25 = sadd.s32 4294967295, %s2246_s24   ;;  %s2246_s24 = sphi %s2344_s24, %s2991_s24   ;;  %s2242_s23 = sphi %s2342_s23, %s2990_s23   ;;  %s2238_s22 = sphi %s2340_s22, %s2989_s22   ;;  %s2234_s21 = sphi %s2338_s21, %s2988_s21  }
   0x9   : > { %s2043_s26 = sadd.s32 4294967294, %s2246_s24   ;;  %s2363_s27 = sadd.s32 1, %s2246_s24  }
   0xa   : > { %s377_s28 = sadd.s32 1, %s2242_s23  ;;  %s374_s29 = ssub.s32 %s2246_s24, %s2363_s27 }
   0xb   : > { %p387_p0 = scmp.ne.s32.totalorder %s2242_s23, %s2238_s22  ;;  %p375_p1 = scmp.eq.s32.totalorder %s374_s29, 0 }
   0xc   : > { %p388_p2 = scmp.eq.s32.totalorder %s2359_s25, 3  ;;  %p393_p3 = scmp.ne.s32.totalorder %s2238_s22, %s2234_s21 }
   0xd   : > { %p394_p4 = scmp.eq.s32.totalorder %s2043_s26, 3  ;;  %p2046_p7 = scmp.ge.s32.totalorder %s2246_s24, 1 }
   0xe   : > { %s2374_s30 = scalar_select %p375_p1, %s2242_s23, %s377_s28  }
   0xf   : > { %p2376_p5 = por %p388_p2, %p387_p0  ;;  %p2380_p6 = por %p394_p4, %p393_p3 }
  0x10   : > { %2979 = sst [smem:[#allocation6_spill]] %s2374_s30  ;;  %p466_p8 = scmp.lt.s32.totalorder %s2246_s24, 5 }
  0x12   : > { %p467_p9 = pnand %p2046_p7, %p466_p8 }
  0x13   : > { %s2982_s1 = sld [smem:[#allocation8_spill]] (!%p467_p9)  ;;  %v2248_v1 = vmov (!%p467_p9), 2   ;;  %v2249_v2 = vmov (!%p467_p9), 1   ;;  %v2250_v5 = vmov (!%p467_p9), 0   ;;  %s2983_s2 = sld [smem:[#allocation9_spill]] (!%p467_p9)  ;;  %v839_v15 = vld [vmem:[%s2960_s4 + $0x8] sm:$0xff] (!%p467_p9)  ;;  %v574_v36 = vlaneseq (!%p467_p9) }
  0x14   : > { %470 = sbr.rel (%p467_p9) target bundleno = 1703 (0x6a7), region = 84  ;;  %2136 = vset.pattern.permute.xlu0 (!%p467_p9), %v2248_v1  ;;  %2135 = vset.pattern.permute.xlu1 (!%p467_p9), %v2249_v2  ;;  %v841_v16 = vld [vmem:[%s2960_s4 + $0x18] sm:$0xff] (!%p467_p9)  ;;  %v843_v18 = vld [vmem:[%s2960_s4 + $0x28] sm:$0xff] (!%p467_p9)  ;;  %v838_v24 = vld [vmem:[%s2960_s4] sm:$0xff] (!%p467_p9)  ;;  %s2048_s30 = sshll.u32 (!%p467_p9), %s2359_s25, 1  ;;  %vm906_vm0 = vcmask (!%p467_p9), 523264  }
  0x15   : > { %951 = vmatprep.mubr.bf16.mxu0 (!%p467_p9), %v2250_v5  ;;  %1070 = vmatprep.mubr.bf16.mxu1 (!%p467_p9), %v2250_v5  ;;  %v845_v20 = vld [vmem:[%s2960_s4 + $0x38] sm:$0xff] (!%p467_p9)  ;;  %v1019_v21 = vld [vmem:[%s2962_s6 + $0x8] sm:$0xff] (!%p467_p9)  ;;  %v840_v25 = vld [vmem:[%s2960_s4 + $0x10] sm:$0xff] (!%p467_p9)  ;;  %p517_p10 = scmp.lt.s32.totalorder (!%p467_p9), %s2048_s30, 7  ;;  %v2495_v38 = vshrl.u32 (!%p467_p9), %v574_v36, 7  ;;  %s2984_s20 = sld [smem:[#allocation7_spill]] (!%p467_p9) }
  0x16   : > { %v842_v26 = vld [vmem:[%s2960_s4 + $0x20] sm:$0xff] (!%p467_p9)  ;;  %v844_v27 = vld [vmem:[%s2960_s4 + $0x30] sm:$0xff] (!%p467_p9)  ;;  %s2985_s3 = sld [smem:[#allocation10_spill]] (!%p467_p9)  ;;  %vm1327_vm1 = vcmask (!%p467_p9), 130048   ;;  %vm1965_vm2 = vcmp.lt.s32.totalorder (!%p467_p9), %v574_v36, 256  ;;  %v2175_v36 = vld [vmem:[%s2964_s8 + $0x18] sm:$0xff] (!%p467_p9)  }
  0x17   : > { %v1018_v28 = vld [vmem:[%s2962_s6] sm:$0xff] (!%p467_p9)  ;;  %v632_v41 = vsub.s32 (!%p467_p9), 1, %v2495_v38  ;;  %v576_v42 = vsub.s32 (!%p467_p9), 0, %v2495_v38  ;;  %v704_v46 = vsub.s32 (!%p467_p9), 2, %v2495_v38 }
  0x18   : > { %v1081_v29 = vld [vmem:[%s2963_s7] sm:$0xff] (!%p467_p9) }
  0x19   : > { %v526_v0 = vld [vmem:[%s2982_s1] sm:$0xff] (!%p467_p9)  ;;  %v528_v3 = vld [vmem:[%s2982_s1 + $0x10] sm:$0xff] (!%p467_p9)  ;;  %v527_v4 = vld [vmem:[%s2982_s1 + $0x8] sm:$0xff] (!%p467_p9) }
  0x1a   : > { %671 = vperm.xlu0 (!%p467_p9), %2136, %v526_v0   ;;  %599 = vperm.xlu1 (!%p467_p9), %2135, %v526_v0   ;;  %v531_v6 = vld [vmem:[%s2982_s1 + $0x28] sm:$0xff] (!%p467_p9)  ;;  %v530_v7 = vld [vmem:[%s2982_s1 + $0x20] sm:$0xff] (!%p467_p9)  ;;  %v533_v8 = vld [vmem:[%s2982_s1 + $0x38] sm:$0xff] (!%p467_p9) }
  0x1b   : > { %v529_v9 = vld [vmem:[%s2982_s1 + $0x18] sm:$0xff]  ;;  %v742_v10 = vld [vmem:[%s2983_s2] sm:$0xff]  ;;  %v743_v11 = vld [vmem:[%s2983_s2 + $0x8] sm:$0xff]  ;;  %s2993_s30 = smov (!%p517_p10, %s2048_s30), 7 }
  0x1c   : > { %v532_v12 = vld [vmem:[%s2982_s1 + $0x30] sm:$0xff]  ;;  %v746_v13 = vld [vmem:[%s2983_s2 + $0x20] sm:$0xff]  ;;  %v749_v14 = vld [vmem:[%s2983_s2 + $0x38] sm:$0xff]  ;;  %s2049_s18 = sshll.u32 %s2993_s30, 3  ;;  %s2091_s30 = sshll.u32 %s2359_s25, 7 }
  0x1d   : > { %v744_v17 = vld [vmem:[%s2983_s2 + $0x10] sm:$0xff]  ;;  %v745_v19 = vld [vmem:[%s2983_s2 + $0x18] sm:$0xff]  ;;  %v747_v22 = vld [vmem:[%s2983_s2 + $0x28] sm:$0xff]  ;;  %s520_s26 = scalar_lea.vmem %s2984_s20, %s2049_s18  ;;  %s2252_s25 = smov [#allocation2]  }
  0x1e   : > { %679 = vperm.xlu0 %2136, %v528_v3   ;;  %603 = vperm.xlu1 %2135, %v527_v4   ;;  %v748_v23 = vld [vmem:[%s2983_s2 + $0x30] sm:$0xff]  ;;  %v2504_v43 = vld [vmem:[%s520_s26] sm:$0x3f]  ;;  %v2506_v44 = vld [vmem:[%s520_s26 + $0x8] sm:$0x3f]  ;;  %s513_s26 = sand.u32 1, %s2238_s22   ;;  %s2911_s2 = scalar_lea.hbm %s2972_s16, %s2091_s30 }
  0x1f   : > { %v2510_v47 = vrot.slane %v2504_v43, %v632_v41  ;;  %v2513_v48 = vrot.slane %v2506_v44, %v632_v41  ;;  %v2516_v49 = vrot.slane %v2504_v43, %v576_v42  ;;  %v2519_v50 = vrot.slane %v2506_v44, %v576_v42  ;;  %s2047_s23 = sshll.u32 %s513_s26, 3  ;;  %s1970_s28 = scalar_lea.sflag [#allocation3], %s513_s26 }
  0x20   : > { %v2526_v57 = vrot.slane %v2504_v43, %v704_v46  ;;  %v2529_v58 = vrot.slane %v2506_v44, %v704_v46  ;;  %s2731_s19 = scalar_lea.vmem [#allocation2], %s2047_s23  ;;  %s2188_s23 = sshll.u32 %s2252_s25, 4  ;;  %s2189_s23 = int_to_ptr.vmem [resolvable:$false] %s2188_s23 }
  0x21   : > { %s1984_s18 = sshll.u32 %s2731_s19, 4  ;;  %s2913_s18 = int_to_ptr.vmem [resolvable:$true] %s1984_s18 }
  0x22   : > { %691 = vperm.xlu0 %2136, %v531_v6   ;;  %2137 = vset.pattern.permute.xlu1 %v2248_v1  ;;  %s2184_s29 = scalar_lea.vmem %s2913_s18, 128  ;;  %p2191_p0 = scmp.lt.s32.totalorder %s2913_s18, %s2189_s23 }
  0x23   : > { %675 = vperm.xlu1 %2137, %v527_v4   ;;  %p2185_p11 = scmp.ne.s32.totalorder %s2913_s18, %s2184_s29 }
  0x25   : > { %p2186_p12 = pnand %p2185_p11, %p2376_p5 }
  0x26   : > { %2144 = vset.pattern.permute.xlu0 %v2249_v2 }
  0x27   : > { %615 = vperm.xlu0 %2144, %v530_v7   ;;  %2138 = vset.pattern.permute.xlu1 %v2250_v5  ;;  %p2187_p13 = pneg %p2186_p12 }
  0x28   : > { %546 = vperm.xlu1 %2138, %v528_v3  }
  0x2b   : > { %627 = vperm.xlu0 %2144, %v533_v8  }
  0x2c   : > { %2139 = vset.pattern.permute.xlu1 %v2249_v2 }
  0x2d   : > { %607 = vperm.xlu1 %2139, %v528_v3  }
  0x2f   : > { %2147 = vset.pattern.permute.xlu0 %v2250_v5 }
  0x30   : > { %536 = vperm.xlu0 %2147, %v526_v0  }
  0x31   : > { %611 = vperm.xlu1 %2139, %v529_v9  }
  0x34   : > { %541 = vperm.xlu0 %2147, %v527_v4  }
  0x35   : > { %2140 = vset.pattern.permute.xlu1 %v2248_v1 }
  0x36   : > { %683 = vperm.xlu1 %2140, %v529_v9  }
  0x38   : > { %551 = vperm.xlu0 %2147, %v529_v9  }
  0x3a   : > { %2141 = vset.pattern.permute.xlu1 %v2250_v5 }
  0x3b   : > { %752 = vperm.xlu1 %2141, %v742_v10  }
  0x3c   : > { %757 = vperm.xlu0 %2147, %v743_v11  }
  0x3f   : > { %556 = vperm.xlu1 %2141, %v530_v7  }
  0x40   : > { %566 = vperm.xlu0 %2147, %v532_v12  }
  0x43   : > { %561 = vperm.xlu1 %2141, %v531_v6  }
  0x44   : > { %772 = vperm.xlu0 %2147, %v746_v13  }
  0x47   : > { %2142 = vset.pattern.permute.xlu1 %v2249_v2 }
  0x48   : > { %787 = vperm.xlu0 %2147, %v749_v14   ;;  %619 = vperm.xlu1 %2142, %v531_v6  }
  0x4c   : > { %853 = vperm.xlu0 %2147, %v839_v15   ;;  %2143 = vset.pattern.permute.xlu1 %v2248_v1 }
  0x4d   : > { %687 = vperm.xlu1 %2143, %v530_v7  }
  0x50   : > { %863 = vperm.xlu0 %2147, %v841_v16  }
  0x51   : > { %2145 = vset.pattern.permute.xlu1 %v2250_v5 }
  0x52   : > { %762 = vperm.xlu1 %2145, %v744_v17  }
  0x54   : > { %873 = vperm.xlu0 %2147, %v843_v18  }
  0x56   : > { %767 = vperm.xlu1 %2145, %v745_v19  }
  0x58   : > { %883 = vperm.xlu0 %2147, %v845_v20  }
  0x5a   : > { %571 = vperm.xlu1 %2145, %v533_v8  }
  0x5c   : > { %1027 = vperm.xlu0 %2147, %v1019_v21  }
  0x5e   : > { %2146 = vset.pattern.permute.xlu1 %v2249_v2 }
  0x5f   : > { %623 = vperm.xlu1 %2146, %v532_v12  }
  0x60   : > { %2151 = vset.pattern.permute.xlu0 %v2249_v2 }
  0x63   : > { %2148 = vset.pattern.permute.xlu1 %v2248_v1 }
  0x64   : > { %695 = vperm.xlu1 %2148, %v532_v12  }
  0x68   : > { %699 = vperm.xlu1 %2148, %v533_v8  }
  0x6c   : > { %2149 = vset.pattern.permute.xlu1 %v2250_v5 }
  0x6d   : > { %777 = vperm.xlu1 %2149, %v747_v22  }
  0x71   : > { %782 = vperm.xlu1 %2149, %v748_v23  }
  0x75   : > { %848 = vperm.xlu1 %2149, %v838_v24  }
  0x79   : > { %858 = vperm.xlu1 %2149, %v840_v25  }
  0x7d   : > { %868 = vperm.xlu1 %2149, %v842_v26  }
  0x81   : > { %878 = vperm.xlu1 %2149, %v844_v27  }
  0x85   : > { %1022 = vperm.xlu1 %2149, %v1018_v28  }
  0x89   : > { %1091 = vperm.xlu1 %2149, %v1081_v29  }
  0x8d   : > { %2150 = vset.pattern.permute.xlu1 %v2249_v2 }
  0x8e   : > { %1154 = vperm.xlu1 %2150, %v1081_v29  }
  0x92   : > { %2152 = vset.pattern.permute.xlu1 %v2248_v1 }
  0x93   : > { %1226 = vperm.xlu1 %2152, %v1081_v29  }
  0x99   : > { %v600_v30 = vpop.permute.xlu1 %599  ;;  %v672_v31 = vpop.permute.xlu0 %671 }
  0x9a   : > { %v638_v55 = vmul.f32 %v2510_v47, %v600_v30  ;;  %v639_v56 = vmul.f32 %v2513_v48, %v600_v30  ;;  %v710_v0 = vmul.f32 %v2526_v57, %v672_v31  ;;  %v711_v3 = vmul.f32 %v2529_v58, %v672_v31 }
  0x9d   : > { %v604_v32 = vpop.permute.xlu1 %603  ;;  %v2488_v33 = vpop.permute.xlu0 %679 }
  0x9e   : > { %v640_v60 = vmul.f32 %v2510_v47, %v604_v32  ;;  %v641_v61 = vmul.f32 %v2513_v48, %v604_v32 }
  0xa1   : > { %v2490_v34 = vpop.permute.xlu0 %691 }
  0xa2   : > { %v676_v35 = vpop.permute.xlu1 %675 }
  0xa3   : > { %v712_v11 = vmul.f32 %v2526_v57, %v676_v35  ;;  %v713_v12 = vmul.f32 %v2529_v58, %v676_v35 }
  0xa6   : > { %v2492_v37 = vpop.permute.xlu0 %615 }
  0xa7   : > { %v547_v39 = vpop.permute.xlu1 %546 }
  0xa8   : > { %v586_v41 = vmul.f32 %v2516_v49, %v547_v39  ;;  %v587_v42 = vmul.f32 %v2519_v50, %v547_v39 }
  0xaa   : > { %v2500_v40 = vpop.permute.xlu0 %627 }
  0xac   : > { %v608_v45 = vpop.permute.xlu1 %607 }
  0xad   : > { %v642_v32 = vmul.f32 %v2510_v47, %v608_v45  ;;  %v643_v35 = vmul.f32 %v2513_v48, %v608_v45 }
  0xaf   : > { %v537_v51 = vpop.permute.xlu0 %536 }
  0xb0   : > { %v612_v52 = vpop.permute.xlu1 %611  ;;  %v582_v53 = vmul.f32 %v2516_v49, %v537_v51  ;;  %v583_v54 = vmul.f32 %v2519_v50, %v537_v51 }
  0xb1   : > { %v645_v45 = vmul.f32 %v2513_v48, %v612_v52 }
  0xb2   : > { %v654_v4 = vadd.f32 %v638_v55, %v582_v53  ;;  %v655_v6 = vadd.f32 %v639_v56, %v583_v54  ;;  %v714_v54 = vmul.f32 %v2526_v57, %v2488_v33  ;;  %v715_v55 = vmul.f32 %v2529_v58, %v2488_v33 }
  0xb3   : > { %v542_v59 = vpop.permute.xlu0 %541  ;;  %v658_v56 = vadd.f32 %v642_v32, %v586_v41 }
  0xb4   : > { %v584_v62 = vmul.f32 %v2516_v49, %v542_v59  ;;  %v585_v63 = vmul.f32 %v2519_v50, %v542_v59  ;;  %v726_v13 = vadd.f32 %v710_v0, %v654_v4  ;;  %v727_v14 = vadd.f32 %v711_v3, %v655_v6 }
  0xb5   : > { %v684_v7 = vpop.permute.xlu1 %683  ;;  %v659_v59 = vadd.f32 %v643_v35, %v587_v42  ;;  %v730_v3 = vadd.f32 %v714_v54, %v658_v56 }
  0xb6   : > { %v656_v8 = vadd.f32 %v640_v60, %v584_v62  ;;  %v657_v9 = vadd.f32 %v641_v61, %v585_v63  ;;  %v644_v60 = vmul.f32 %v2510_v47, %v612_v52  ;;  %v716_v63 = vmul.f32 %v2526_v57, %v684_v7 }
  0xb7   : > { %v552_v10 = vpop.permute.xlu0 %551  ;;  %v717_v0 = vmul.f32 %v2529_v58, %v684_v7  ;;  %v731_v4 = vadd.f32 %v715_v55, %v659_v59  ;;  %v646_v7 = vmul.f32 %v2510_v47, %v2492_v37  ;;  %v653_v55 = vmul.f32 %v2513_v48, %v2500_v40 }
  0xb8   : > { %v728_v16 = vadd.f32 %v712_v11, %v656_v8  ;;  %v729_v17 = vadd.f32 %v713_v12, %v657_v9  ;;  %v588_v46 = vmul.f32 %v2516_v49, %v552_v10  ;;  %v589_v51 = vmul.f32 %v2519_v50, %v552_v10 }
  0xba   : > { %v753_v15 = vpop.permute.xlu1 %752  ;;  %v660_v61 = vadd.f32 %v644_v60, %v588_v46  ;;  %v661_v62 = vadd.f32 %v645_v45, %v589_v51  ;;  %v720_v46 = vmul.f32 %v2526_v57, %v2490_v34  ;;  %v721_v51 = vmul.f32 %v2529_v58, %v2490_v34 }
  0xbb   : > { %v790_v18 = vadd.f32 %v753_v15, %v726_v13  ;;  %v791_v19 = vadd.f32 %v753_v15, %v727_v14  ;;  %v758_v20 = vpop.permute.xlu0 %757 }
  0xbc   : > { %v792_v21 = vadd.f32 %v758_v20, %v728_v16  ;;  %v793_v22 = vadd.f32 %v758_v20, %v729_v17  ;;  %v732_v9 = vadd.f32 %v716_v63, %v660_v61  ;;  %v733_v10 = vadd.f32 %v717_v0, %v661_v62 }
  0xbd   : > { %v806_v23 = vmax.f32 %v790_v18, 0.0  ;;  %v807_v24 = vmax.f32 %v791_v19, 0.0  ;;  %v647_v20 = vmul.f32 %v2513_v48, %v2492_v37 }
  0xbe   : > { %v808_v25 = vmax.f32 %v792_v21, 0.0  ;;  %v557_v26 = vpop.permute.xlu1 %556  ;;  %v809_v27 = vmax.f32 %v793_v22, 0.0 }
  0xbf   : > { %v590_v21 = vmul.f32 %v2516_v49, %v557_v26  ;;  %v591_v22 = vmul.f32 %v2519_v50, %v557_v26 }
  0xc0   : > { %v831_v28 = vpack.c.bf16 %v809_v27, %v807_v24  ;;  %v830_v29 = vpack.c.bf16 %v808_v25, %v806_v23  ;;  %v567_v23 = vpop.permute.xlu0 %566 }
  0xc1   : > { %v662_v32 = vadd.f32 %v646_v7, %v590_v21  ;;  %v663_v35 = vadd.f32 %v647_v20, %v591_v22  ;;  %v595_v63 = vmul.f32 %v2519_v50, %v567_v23 }
  0xc2   : > { %v562_v30 = vpop.permute.xlu1 %561  ;;  %919 = vmatprep.subr.bf16.mxu0 %v831_v28 }
  0xc3   : > { %920 = vmatpush1.bf16.msra.mxu0 %v830_v29  ;;  %v592_v41 = vmul.f32 %v2516_v49, %v562_v30  ;;  %v593_v37 = vmul.f32 %v2519_v50, %v562_v30 }
  0xc4   : > { %v773_v60 = vpop.permute.xlu0 %772 }
  0xc7   : > { %v620_v31 = vpop.permute.xlu1 %619 }
  0xc8   : > { %v648_v27 = vmul.f32 %v2510_v47, %v620_v31  ;;  %v649_v28 = vmul.f32 %v2513_v48, %v620_v31  ;;  %v652_v31 = vmul.f32 %v2510_v47, %v2500_v40 }
  0xca   : > { %v664_v56 = vadd.f32 %v648_v27, %v592_v41  ;;  %v665_v30 = vadd.f32 %v649_v28, %v593_v37  ;;  %v2169_v41 = vld [vmem:[%s2985_s3 + $0x10] sm:$0xff]   ;;  %v2170_v37 = vld [vmem:[%s2985_s3 + $0x18] sm:$0xff]  }
  0xcc   : > { %v688_v53 = vpop.permute.xlu1 %687 }
  0xcd   : > { %v718_v24 = vmul.f32 %v2526_v57, %v688_v53  ;;  %v719_v25 = vmul.f32 %v2529_v58, %v688_v53 }
  0xcf   : > { %v734_v53 = vadd.f32 %v718_v24, %v662_v32  ;;  %v735_v54 = vadd.f32 %v719_v25, %v663_v35  ;;  %v2167_v32 = vld [vmem:[%s2985_s3] sm:$0xff]   ;;  %v2168_v35 = vld [vmem:[%s2985_s3 + $0x8] sm:$0xff]   ;;  %s2190_s3 = scalar_lea.vmem %s2189_s23, 256 }
  0xd0   : > { %p2192_p1 = scmp.lt.s32.totalorder %s2190_s3, %s2184_s29 }
  0xd1   : > { %v763_v39 = vpop.permute.xlu1 %762  ;;  %v799_v40 = vadd.f32 %v773_v60, %v735_v54 }
  0xd2   : > { %v794_v6 = vadd.f32 %v763_v39, %v730_v3  ;;  %v795_v8 = vadd.f32 %v763_v39, %v731_v4  ;;  %v594_v39 = vmul.f32 %v2516_v49, %v567_v23  ;;  %v798_v4 = vadd.f32 %v773_v60, %v734_v53  ;;  %p2193_p2 = por %p2192_p1, %p2191_p0 }
  0xd4   : > { %v810_v13 = vmax.f32 %v794_v6, 0.0  ;;  %v811_v14 = vmax.f32 %v795_v8, 0.0  ;;  %p2194_p3 = pnand %p2193_p2, %p2187_p13 }
  0xd5   : > { %v768_v33 = vpop.permute.xlu1 %767 }
  0xd6   : > { %v796_v11 = vadd.f32 %v768_v33, %v732_v9  ;;  %v797_v12 = vadd.f32 %v768_v33, %v733_v10  ;;  %v736_v10 = vadd.f32 %v720_v46, %v664_v56 }
  0xd8   : > { %v812_v15 = vmax.f32 %v796_v11, 0.0  ;;  %v813_v52 = vmax.f32 %v797_v12, 0.0 }
  0xd9   : > { %v572_v16 = vpop.permute.xlu1 %571 }
  0xda   : > { %v833_v17 = vpack.c.bf16 %v813_v52, %v811_v14  ;;  %v832_v18 = vpack.c.bf16 %v812_v15, %v810_v13  ;;  %v596_v42 = vmul.f32 %v2516_v49, %v572_v16  ;;  %v597_v26 = vmul.f32 %v2519_v50, %v572_v16  ;;  %v788_v49 = vpop.permute.xlu0 %787 }
  0xdb   : > { %v815_v52 = vmax.f32 %v799_v40, 0.0  ;;  %v814_v16 = vmax.f32 %v798_v4, 0.0 }
  0xdc   : > { %921 = vmatprep.subr.bf16.mxu0 %v833_v17  ;;  %v668_v0 = vadd.f32 %v652_v31, %v596_v42  ;;  %v669_v3 = vadd.f32 %v653_v55, %v597_v26 }
  0xdd   : > { %922 = vmatpush1.bf16.msra.mxu0 %v832_v18 }
  0xde   : > { %v624_v19 = vpop.permute.xlu1 %623  ;;  %v854_v53 = vpop.permute.xlu0 %853 }
  0xdf   : > { %v650_v45 = vmul.f32 %v2510_v47, %v624_v19  ;;  %v651_v61 = vmul.f32 %v2513_v48, %v624_v19  ;;  %v737_v48 = vadd.f32 %v721_v51, %v665_v30 }
  0xe1   : > { %v666_v33 = vadd.f32 %v650_v45, %v594_v39  ;;  %v667_v11 = vadd.f32 %v651_v61, %v595_v63 }
  0xe2   : > { %v864_v4 = vpop.permute.xlu0 %863 }
  0xe3   : > { %v696_v29 = vpop.permute.xlu1 %695 }
  0xe4   : > { %v722_v6 = vmul.f32 %v2526_v57, %v696_v29  ;;  %v723_v8 = vmul.f32 %v2529_v58, %v696_v29 }
  0xe6   : > { %v738_v15 = vadd.f32 %v722_v6, %v666_v33  ;;  %v739_v50 = vadd.f32 %v723_v8, %v667_v11 }
  0xe7   : > { %v700_v59 = vpop.permute.xlu1 %699 }
  0xe8   : > { %v724_v62 = vmul.f32 %v2526_v57, %v700_v59  ;;  %v725_v34 = vmul.f32 %v2529_v58, %v700_v59 }
  0xea   : > { %v740_v9 = vadd.f32 %v724_v62, %v668_v0  ;;  %v741_v47 = vadd.f32 %v725_v34, %v669_v3 }
  0xec   : > { %v778_v12 = vpop.permute.xlu1 %777  ;;  %v804_v17 = vadd.f32 %v788_v49, %v740_v9  ;;  %v805_v18 = vadd.f32 %v788_v49, %v741_v47 }
  0xed   : > { %v800_v13 = vadd.f32 %v778_v12, %v736_v10  ;;  %v801_v14 = vadd.f32 %v778_v12, %v737_v48 }
  0xee   : > { %v821_v25 = vmax.f32 %v805_v18, 0.0  ;;  %v820_v27 = vmax.f32 %v804_v17, 0.0 }
  0xef   : > { %v816_v19 = vmax.f32 %v800_v13, 0.0  ;;  %v817_v57 = vmax.f32 %v801_v14, 0.0 }
  0xf0   : > { %v783_v7 = vpop.permute.xlu1 %782 }
  0xf1   : > { %v802_v58 = vadd.f32 %v783_v7, %v738_v15  ;;  %v803_v20 = vadd.f32 %v783_v7, %v739_v50  ;;  %v835_v21 = vpack.c.bf16 %v817_v57, %v815_v52  ;;  %v834_v22 = vpack.c.bf16 %v816_v19, %v814_v16  ;;  %v874_v52 = vpop.permute.xlu0 %873 }
  0xf3   : > { %v818_v23 = vmax.f32 %v802_v58, 0.0  ;;  %v819_v24 = vmax.f32 %v803_v20, 0.0  ;;  %923 = vmatprep.subr.bf16.mxu0 %v835_v21 }
  0xf4   : > { %924 = vmatpush1.bf16.msra.mxu0 %v834_v22  ;;  %v849_v42 = vpop.permute.xlu1 %848 }
  0xf5   : > { %v837_v28 = vpack.c.bf16 %v821_v25, %v819_v24  ;;  %v836_v29 = vpack.c.bf16 %v820_v27, %v818_v23 }
  0xf7   : > { %925 = vmatprep.subr.bf16.mxu0 %v837_v28 }
  0xf8   : > { %926 = vmatpush1.bf16.msra.mxu0 %v836_v29  ;;  %v859_v34 = vpop.permute.xlu1 %858  ;;  %v884_v29 = vpop.permute.xlu0 %883 }
  0xfb   : > { %2054 = vmatmul.mubr.msk.bf16.vlgmr.msra.gmra.mrb[0].mxu0 %vm906_vm0, %v2167_v32 }
  0xfc   : > { %961 = vmatprep.mubr.bf16.mxu0 %v2250_v5  ;;  %v869_v13 = vpop.permute.xlu1 %868 }
 0x100   : > { %v879_v23 = vpop.permute.xlu1 %878 }
 0x103   : > { %2055 = vmatmul.mubr.msk.bf16.gmra.mrb[4].mxu0 %vm906_vm0, %v2168_v35 }
 0x104   : > { %971 = vmatprep.mubr.bf16.mxu0 %v2250_v5 }
 0x10b   : > { %2056 = vmatmul.mubr.msk.bf16.gmra.mrb[8].mxu0 %vm906_vm0, %v2169_v41 }
 0x10c   : > { %981 = vmatprep.mubr.bf16.mxu0 %v2250_v5 }
 0x113   : > { %2057 = vmatmul.mubr.msk.bf16.gmra.mrb[12].mxu0 %vm906_vm0, %v2170_v37 }
 0x114   : > { %1637 = vmatprep.mubr.bf16.mxu0 %v2250_v5 }
 0x1ce   : > { %v953_v26 = vpop.f32.mrb[0].mxu0 }
 0x1cf   : > { %v954_v46 = vadd.f32 %v953_v26, %v849_v42  ;;  %v955_v51 = vpop.f32.mrb[1].mxu0 }
 0x1d0   : > { %v956_v54 = vadd.f32 %v955_v51, %v849_v42  ;;  %v957_v31 = vpop.f32.mrb[2].mxu0 }
 0x1d1   : > { %v958_v55 = vadd.f32 %v957_v31, %v854_v53  ;;  %v959_v56 = vpop.f32.mrb[3].mxu0  ;;  %v992_v59 = vmax.f32 %v954_v46, 0.0 }
 0x1d2   : > { %v960_v30 = vadd.f32 %v959_v56, %v854_v53  ;;  %v993_v45 = vmax.f32 %v956_v54, 0.0  ;;  %v1082_v56 = vld [vmem:[%s2963_s7 + $0x8] sm:$0xff] }
 0x1d3   : > { %v994_v60 = vmax.f32 %v958_v55, 0.0  ;;  %v2171_v55 = vld [vmem:[%s2961_s5] sm:$0xff]   ;;  %1230 = vperm.xlu1 %2152, %v1082_v56   ;;  %1158 = vperm.xlu0 %2151, %v1082_v56  }
 0x1d4   : > { %v995_v61 = vmax.f32 %v960_v30, 0.0  ;;  %v1084_v30 = vld [vmem:[%s2963_s7 + $0x18] sm:$0xff] }
 0x1d5   : > { %v1010_v62 = vpack.c.bf16 %v994_v60, %v992_v59  ;;  %v1083_v59 = vld [vmem:[%s2963_s7 + $0x10] sm:$0xff]  ;;  %v1086_v60 = vld [vmem:[%s2963_s7 + $0x28] sm:$0xff] }
 0x1d6   : > { %v963_v39 = vpop.f32.mrb[4].mxu0  ;;  %v1011_v63 = vpack.c.bf16 %v995_v61, %v993_v45  ;;  %v1085_v45 = vld [vmem:[%s2963_s7 + $0x20] sm:$0xff]  ;;  %v1087_v61 = vld [vmem:[%s2963_s7 + $0x30] sm:$0xff] }
 0x1d7   : > { %v964_v0 = vadd.f32 %v963_v39, %v859_v34  ;;  %v965_v3 = vpop.f32.mrb[5].mxu0  ;;  %2153 = vset.pattern.permute.xlu1 %v2250_v5  ;;  %1166 = vperm.xlu0 %2151, %v1084_v30   ;;  %v1088_v39 = vld [vmem:[%s2963_s7 + $0x38] sm:$0xff] }
 0x1d8   : > { %v966_v40 = vadd.f32 %v965_v3, %v859_v34  ;;  %v967_v6 = vpop.f32.mrb[6].mxu0  ;;  %1038 = vmatprep.subr.bf16.mxu1 %v1011_v63  ;;  %1106 = vperm.xlu1 %2153, %v1084_v30   ;;  %v1430_v34 = vld [vmem:[%s2965_s9 + $0x8] sm:$0xff]  ;;  %v1431_v63 = vld [vmem:[%s2965_s9 + $0x10] sm:$0xff]  ;;  %v1525_v3 = vld [vmem:[%s2967_s11] sm:$0xff] }
 0x1d9   : > { %v968_v8 = vadd.f32 %v967_v6, %v864_v4  ;;  %v969_v9 = vpop.f32.mrb[7].mxu0  ;;  %1039 = vmatpush1.bf16.msra.mxu1 %v1010_v62  ;;  %v996_v10 = vmax.f32 %v964_v0, 0.0  ;;  %v1429_v62 = vld [vmem:[%s2965_s9] sm:$0xff]  ;;  %v1434_v0 = vld [vmem:[%s2965_s9 + $0x28] sm:$0xff] }
 0x1da   : > { %v970_v47 = vadd.f32 %v969_v9, %v864_v4  ;;  %v997_v33 = vmax.f32 %v966_v40, 0.0  ;;  %v1527_v4 = vld [vmem:[%s2967_s11 + $0x10] sm:$0xff]  ;;  %v1432_v40 = vld [vmem:[%s2965_s9 + $0x18] sm:$0xff]  ;;  %v1529_v6 = vld [vmem:[%s2967_s11 + $0x20] sm:$0xff] }
 0x1db   : > { %v998_v48 = vmax.f32 %v968_v8, 0.0  ;;  %1174 = vperm.xlu0 %2151, %v1086_v60   ;;  %v1710_v8 = vld [vmem:[%s2969_s13] sm:$0xff] }
 0x1dc   : > { %v999_v11 = vmax.f32 %v970_v47, 0.0  ;;  %2154 = vset.pattern.permute.xlu1 %v2249_v2  ;;  %v1433_v9 = vld [vmem:[%s2965_s9 + $0x20] sm:$0xff]  ;;  %v1712_v47 = vld [vmem:[%s2969_s13 + $0x10] sm:$0xff] }
 0x1dd   : > { %v1012_v12 = vpack.c.bf16 %v998_v48, %v996_v10  ;;  %1162 = vperm.xlu1 %2154, %v1083_v59   ;;  %v1714_v10 = vld [vmem:[%s2969_s13 + $0x20] sm:$0xff]  ;;  %v1436_v48 = vld [vmem:[%s2965_s9 + $0x38] sm:$0xff] }
 0x1de   : > { %v1013_v14 = vpack.c.bf16 %v999_v11, %v997_v33  ;;  %v973_v49 = vpop.f32.mrb[8].mxu0  ;;  %v1716_v33 = vld [vmem:[%s2969_s13 + $0x30] sm:$0xff]  ;;  %v1526_v11 = vld [vmem:[%s2967_s11 + $0x8] sm:$0xff] }
 0x1df   : > { %v974_v15 = vadd.f32 %v973_v49, %v869_v13  ;;  %v975_v50 = vpop.f32.mrb[9].mxu0  ;;  %2159 = vset.pattern.permute.xlu0 %v2248_v1  ;;  %v1532_v49 = vld [vmem:[%s2967_s11 + $0x38] sm:$0xff] }
 0x1e0   : > { %v976_v16 = vadd.f32 %v975_v50, %v869_v13  ;;  %v977_v17 = vpop.f32.mrb[10].mxu0  ;;  %1040 = vmatprep.subr.bf16.mxu1 %v1013_v14  ;;  %1242 = vperm.xlu0 %2159, %v1085_v45   ;;  %v1528_v13 = vld [vmem:[%s2967_s11 + $0x18] sm:$0xff]  ;;  %v1530_v14 = vld [vmem:[%s2967_s11 + $0x28] sm:$0xff] }
 0x1e1   : > { %v978_v18 = vadd.f32 %v977_v17, %v874_v52  ;;  %v979_v19 = vpop.f32.mrb[11].mxu0  ;;  %1041 = vmatpush1.bf16.msra.mxu1 %v1012_v12  ;;  %v1000_v7 = vmax.f32 %v974_v15, 0.0  ;;  %2155 = vset.pattern.permute.xlu1 %v2248_v1  ;;  %v1888_v12 = vld [vmem:[%s2971_s15] sm:$0x7]  ;;  %v1711_v15 = vld [vmem:[%s2969_s13 + $0x8] sm:$0xff]  ;;  %v1713_v50 = vld [vmem:[%s2969_s13 + $0x18] sm:$0xff] }
 0x1e2   : > { %v980_v57 = vadd.f32 %v979_v19, %v874_v52  ;;  %v1001_v20 = vmax.f32 %v976_v16, 0.0  ;;  %1234 = vperm.xlu1 %2155, %v1083_v59   ;;  %v1715_v52 = vld [vmem:[%s2969_s13 + $0x28] sm:$0xff]  ;;  %v1717_v16 = vld [vmem:[%s2969_s13 + $0x38] sm:$0xff]  ;;  %v2251_v17 = vmov 1966171168  }
 0x1e3   : > { %v1002_v58 = vmax.f32 %v978_v18, 0.0  ;;  %v1947_v18 = vunpack.c.l.s4 %v2251_v17 }
 0x1e4   : > { %v1003_v21 = vmax.f32 %v980_v57, 0.0  ;;  %1250 = vperm.xlu0 %2159, %v1087_v61  }
 0x1e5   : > { %v1014_v22 = vpack.c.bf16 %v1002_v58, %v1000_v7  ;;  %v1948_v57 = vunpack.c.0.s8 %v1947_v18  ;;  %v1028_v7 = vpop.permute.xlu0 %1027 }
 0x1e6   : > { %v1015_v24 = vpack.c.bf16 %v1003_v21, %v1001_v20  ;;  %v983_v25 = vpop.f32.mrb[12].mxu0  ;;  %1238 = vperm.xlu1 %2155, %v1084_v30   ;;  %v1023_v20 = vpop.permute.xlu1 %1022 }
 0x1e7   : > { %v984_v27 = vadd.f32 %v983_v25, %v879_v23  ;;  %v985_v28 = vpop.f32.mrb[13].mxu0 }
 0x1e8   : > { %v986_v32 = vadd.f32 %v985_v28, %v879_v23  ;;  %v987_v35 = vpop.f32.mrb[14].mxu0  ;;  %1042 = vmatprep.subr.bf16.mxu1 %v1015_v24  ;;  %2164 = vset.pattern.permute.xlu0 %v2250_v5  ;;  %v1951_v28 = vsub.s32 %v1948_v57, %v2495_v38 }
 0x1e9   : > { %v988_v41 = vadd.f32 %v987_v35, %v884_v29  ;;  %v989_v37 = vpop.f32.mrb[15].mxu0  ;;  %1043 = vmatpush1.bf16.msra.mxu1 %v1014_v22  ;;  %v1004_v26 = vmax.f32 %v984_v27, 0.0  ;;  %1096 = vperm.xlu0 %2164, %v1082_v56  }
 0x1ea   : > { %v990_v42 = vadd.f32 %v989_v37, %v884_v29  ;;  %v1005_v51 = vmax.f32 %v986_v32, 0.0  ;;  %2156 = vset.pattern.permute.xlu1 %v2250_v5  ;;  %v2172_v37 = vld [vmem:[%s2964_s8] sm:$0xff]  }
 0x1eb   : > { %v1006_v46 = vmax.f32 %v988_v41, 0.0  ;;  %1116 = vperm.xlu1 %2156, %v1086_v60  }
 0x1ec   : > { %v1007_v53 = vmax.f32 %v990_v42, 0.0 }
 0x1ed   : > { %v1016_v54 = vpack.c.bf16 %v1006_v46, %v1004_v26  ;;  %1101 = vperm.xlu0 %2164, %v1083_v59  }
 0x1ee   : > { %v1017_v31 = vpack.c.bf16 %v1007_v53, %v1005_v51  ;;  %v2173_v51 = vld [vmem:[%s2964_s8 + $0x8] sm:$0xff]   ;;  %v2174_v53 = vld [vmem:[%s2964_s8 + $0x10] sm:$0xff]  }
 0x1ef   : > { %2157 = vset.pattern.permute.xlu1 %v2249_v2 }
 0x1f0   : > { %1044 = vmatprep.subr.bf16.mxu1 %v1017_v31  ;;  %1170 = vperm.xlu1 %2157, %v1085_v45  }
 0x1f1   : > { %1045 = vmatpush1.bf16.msra.mxu1 %v1016_v54  ;;  %1111 = vperm.xlu0 %2164, %v1085_v45   ;;  %v1092_v54 = vpop.permute.xlu1 %1091 }
 0x1f4   : > { %2059 = vmatmul.mubr.msk.bf16.vlgmr.msra.gmra.mrb[0].mxu1 %vm906_vm0, %v2171_v55  ;;  %2158 = vset.pattern.permute.xlu1 %v2250_v5 }
 0x1f5   : > { %1372 = vmatprep.mubr.bf16.mxu1 %v2250_v5  ;;  %1439 = vperm.xlu1 %2158, %v1429_v62   ;;  %v1155_v31 = vpop.permute.xlu1 %1154 }
 0x1f6   : > { %1126 = vperm.xlu0 %2164, %v1088_v39  }
 0x1f9   : > { %1444 = vperm.xlu1 %2158, %v1430_v34   ;;  %v1227_v55 = vpop.permute.xlu1 %1226 }
 0x1fa   : > { %1449 = vperm.xlu0 %2164, %v1431_v63  }
 0x1fd   : > { %2160 = vset.pattern.permute.xlu1 %v2248_v1 }
 0x1fe   : > { %1246 = vperm.xlu1 %2160, %v1086_v60   ;;  %1464 = vperm.xlu0 %2164, %v1434_v0  }
 0x202   : > { %2161 = vset.pattern.permute.xlu1 %v2250_v5  ;;  %1535 = vperm.xlu0 %2164, %v1525_v3  }
 0x203   : > { %1121 = vperm.xlu1 %2161, %v1087_v61  }
 0x206   : > { %1545 = vperm.xlu0 %2164, %v1527_v4  }
 0x207   : > { %2162 = vset.pattern.permute.xlu1 %v2249_v2  ;;  %v1531_v2 = vld [vmem:[%s2967_s11 + $0x30] sm:$0xff] }
 0x208   : > { %1178 = vperm.xlu1 %2162, %v1087_v61  }
 0x20a   : > { %1555 = vperm.xlu0 %2164, %v1529_v6  }
 0x20c   : > { %1182 = vperm.xlu1 %2162, %v1088_v39  }
 0x20e   : > { %1565 = vperm.xlu0 %2164, %v1531_v2   ;;  %v1187_v2 = vsub.s32 4, %v2495_v38 }
 0x210   : > { %2163 = vset.pattern.permute.xlu1 %v2250_v5 }
 0x211   : > { %1454 = vperm.xlu1 %2163, %v1432_v40  }
 0x212   : > { %1720 = vperm.xlu0 %2164, %v1710_v8   ;;  %v1131_v8 = vsub.s32 3, %v2495_v38 }
 0x215   : > { %2165 = vset.pattern.permute.xlu1 %v2248_v1  ;;  %v1435_v1 = vld [vmem:[%s2965_s9 + $0x30] sm:$0xff] }
 0x216   : > { %1254 = vperm.xlu1 %2165, %v1088_v39   ;;  %1730 = vperm.xlu0 %2164, %v1712_v47   ;;  %v1259_v47 = vsub.s32 5, %v2495_v38 }
 0x218   : > { %v2786_v38 = vrot.slane %v2506_v44, %v1259_v47 }
 0x21a   : > { %2166 = vset.pattern.permute.xlu1 %v2250_v5  ;;  %1740 = vperm.xlu0 %2164, %v1714_v10   ;;  %v2770_v10 = vrot.slane %v2504_v43, %v1187_v2  ;;  %v1266_v57 = vmul.f32 %v2786_v38, %v1227_v55 }
 0x21b   : > { %1459 = vperm.xlu1 %2166, %v1433_v9  }
 0x21e   : > { %1750 = vperm.xlu0 %2164, %v1716_v33   ;;  %v2776_v33 = vrot.slane %v2506_v44, %v1187_v2 }
 0x21f   : > { %1469 = vperm.xlu1 %2166, %v1435_v1  }
 0x222   : > { %1891 = vperm.xlu0 %2164, %v1888_v12   ;;  %v2782_v12 = vrot.slane %v2504_v43, %v1259_v47 }
 0x223   : > { %1474 = vperm.xlu1 %2166, %v1436_v48   ;;  %v2773_v48 = vrot.slane %v2504_v43, %v1131_v8 }
 0x227   : > { %1540 = vperm.xlu1 %2166, %v1526_v11   ;;  %v2779_v11 = vrot.slane %v2506_v44, %v1131_v8 }
 0x229   : > { %v1138_v18 = vmul.f32 %v2779_v11, %v1092_v54 }
 0x22b   : > { %1550 = vperm.xlu1 %2166, %v1528_v13  }
 0x22f   : > { %1560 = vperm.xlu1 %2166, %v1530_v14   ;;  %v1193_v14 = vmul.f32 %v2770_v10, %v1155_v31 }
 0x233   : > { %1570 = vperm.xlu1 %2166, %v1532_v49  }
 0x237   : > { %1725 = vperm.xlu1 %2166, %v1711_v15  }
 0x23b   : > { %1735 = vperm.xlu1 %2166, %v1713_v50  }
 0x23f   : > { %1745 = vperm.xlu1 %2166, %v1715_v52   ;;  %v1137_v52 = vmul.f32 %v2773_v48, %v1092_v54 }
 0x241   : > { %v1209_v44 = vadd.f32 %v1193_v14, %v1137_v52 }
 0x243   : > { %1755 = vperm.xlu1 %2166, %v1717_v16   ;;  %v1194_v16 = vmul.f32 %v2776_v33, %v1155_v31 }
 0x252   : > { %v1231_v56 = vpop.permute.xlu1 %1230  ;;  %v1159_v62 = vpop.permute.xlu0 %1158 }
 0x253   : > { %v1195_v15 = vmul.f32 %v2770_v10, %v1159_v62  ;;  %v1196_v17 = vmul.f32 %v2776_v33, %v1159_v62 }
 0x256   : > { %v1167_v39 = vpop.permute.xlu0 %1166 }
 0x257   : > { %v1107_v30 = vpop.permute.xlu1 %1106 }
 0x25a   : > { %v2754_v0 = vpop.permute.xlu0 %1174 }
 0x25b   : > { %v1203_v2 = vmul.f32 %v2770_v10, %v2754_v0  ;;  %v1204_v14 = vmul.f32 %v2776_v33, %v2754_v0 }
 0x25c   : > { %v1163_v59 = vpop.permute.xlu1 %1162 }
 0x25f   : > { %v2758_v4 = vpop.permute.xlu0 %1242 }
 0x261   : > { %v1235_v60 = vpop.permute.xlu1 %1234 }
 0x263   : > { %v2762_v6 = vpop.permute.xlu0 %1250 }
 0x265   : > { %v2746_v45 = vpop.permute.xlu1 %1238 }
 0x268   : > { %v1097_v1 = vpop.permute.xlu0 %1096 }
 0x269   : > { %v1139_v50 = vmul.f32 %v2773_v48, %v1097_v1  ;;  %v1140_v43 = vmul.f32 %v2779_v11, %v1097_v1 }
 0x26a   : > { %v2748_v61 = vpop.permute.xlu1 %1116 }
 0x26c   : > { %v1102_v13 = vpop.permute.xlu0 %1101 }
 0x26f   : > { %v2750_v34 = vpop.permute.xlu1 %1170 }
 0x270   : > { %v1201_v0 = vmul.f32 %v2770_v10, %v2750_v34 }
 0x274   : > { %v2752_v63 = vpop.permute.xlu1 %1439 }
 0x278   : > { %v2756_v3 = vpop.permute.xlu1 %1444 }
 0x27d   : > { %v2760_v40 = vpop.permute.xlu1 %1246 }
 0x282   : > { %v2766_v9 = vpop.permute.xlu1 %1121 }
 0x287   : > { %v2788_v49 = vpop.permute.xlu1 %1178 }
 0x2c7   : > { %v1072_v19 = vpop.f32.mrb[0].mxu1 }
 0x2c8   : > { %v1074_v58 = vpop.f32.mrb[1].mxu1  ;;  %v1073_v22 = vadd.f32 %v1072_v19, %v1023_v20  ;;  %v1265_v19 = vmul.f32 %v2782_v12, %v1227_v55  ;;  %v1269_v55 = vmul.f32 %v2782_v12, %v1235_v60 }
 0x2c9   : > { %v1076_v21 = vpop.f32.mrb[2].mxu1  ;;  %v1075_v25 = vadd.f32 %v1074_v58, %v1023_v20  ;;  %v1199_v58 = vmul.f32 %v2770_v10, %v1167_v39  ;;  %v1200_v20 = vmul.f32 %v2776_v33, %v1167_v39 }
 0x2ca   : > { %v1077_v23 = vadd.f32 %v1076_v21, %v1028_v7  ;;  %v1078_v24 = vpop.f32.mrb[3].mxu1  ;;  %v1143_v21 = vmul.f32 %v2773_v48, %v1107_v30 }
 0x2cb   : > { %v1079_v27 = vadd.f32 %v1078_v24, %v1028_v7  ;;  %v1267_v7 = vmul.f32 %v2782_v12, %v1231_v56  ;;  %v1112_v24 = vpop.permute.xlu0 %1111 }
 0x2cc   : > { %v1305_v29 = vpack.c.bf16 %v1077_v23, %v1073_v22  ;;  %v1144_v22 = vmul.f32 %v2779_v11, %v1107_v30 }
 0x2cd   : > { %v1306_v32 = vpack.c.bf16 %v1079_v27, %v1075_v25  ;;  %v1945_v35 = vcombine.high %v1077_v23, %v1079_v27  ;;  %v1211_v23 = vadd.f32 %v1195_v15, %v1139_v50  ;;  %v1210_v25 = vadd.f32 %v1194_v16, %v1138_v18 }
 0x2ce   : > { %v1268_v27 = vmul.f32 %v2786_v38, %v1231_v56  ;;  %v1270_v56 = vmul.f32 %v2786_v38, %v1235_v60  ;;  %v1271_v16 = vmul.f32 %v2782_v12, %v2746_v45 }
 0x2cf   : > { %v1952_v41 = vrot.slane %v1945_v35, %v1951_v28  ;;  %1340 = vmatprep.subr.bf16.mxu1 %v1306_v32  ;;  %v1197_v32 = vmul.f32 %v2770_v10, %v1163_v59  ;;  %v1141_v35 = vmul.f32 %v2773_v48, %v1102_v13  ;;  %v1283_v31 = vadd.f32 %v1267_v7, %v1211_v23  ;;  %v1127_v8 = vpop.permute.xlu0 %1126 }
 0x2d0   : > { %1341 = vmatpush1.bf16.msra.mxu1 %v1305_v29  ;;  %v2805_v29 = vpop.permute.xlu1 %1182 }
 0x2d1   : > { %v1953_v42 = vcombine.high %v1952_v41, %v1952_v41  ;;  %v1281_v41 = vadd.f32 %v1265_v19, %v1209_v44  ;;  %v1148_v19 = vmul.f32 %v2779_v11, %v2748_v61 }
 0x2d3   : > { %v1960_v26 = vrot.slane %v1953_v42, %v1951_v28  ;;  %2064 = vmatmul.mubr.msk.bf16.vlgmr.msra.gmra.mrb[4].mxu1 %vm1327_vm1, %v2172_v37  ;;  %v1212_v28 = vadd.f32 %v1196_v17, %v1140_v43  ;;  %v1198_v37 = vmul.f32 %v2776_v33, %v1163_v59  ;;  %v1142_v42 = vmul.f32 %v2779_v11, %v1102_v13 }
 0x2d4   : > { %1382 = vmatprep.mubr.bf16.mxu1 %v2250_v5  ;;  %v1213_v59 = vadd.f32 %v1197_v32, %v1141_v35  ;;  %v1455_v50 = vpop.permute.xlu1 %1454  ;;  %v1272_v17 = vmul.f32 %v2786_v38, %v2746_v45  ;;  %v1147_v43 = vmul.f32 %v2773_v48, %v2748_v61  ;;  %v1273_v61 = vmul.f32 %v2782_v12, %v2758_v4 }
 0x2d5   : > { %v1961_v46 = vcombine.high %v1960_v26, %v1960_v26  ;;  %v1284_v39 = vadd.f32 %v1268_v27, %v1212_v28  ;;  %v1214_v15 = vadd.f32 %v1198_v37, %v1142_v42  ;;  %v1450_v27 = vpop.permute.xlu0 %1449 }
 0x2d7   : > { %2085 = vst.msk [vmem:[%s2731_s19 + $0x3] ss:$4 sm:$0x3] %vm1965_vm2, %v1961_v46  ;;  %v1282_v46 = vadd.f32 %v1266_v57, %v1210_v25  ;;  %v1145_v57 = vmul.f32 %v2773_v48, %v1112_v24  ;;  %v1286_v25 = vadd.f32 %v1270_v56, %v1214_v15  ;;  %v1220_v56 = vadd.f32 %v1204_v14, %v1148_v19 }
 0x2d8   : > { %v1205_v14 = vmul.f32 %v2770_v10, %v2788_v49 }
 0x2db   : > { %2065 = vmatmul.mubr.msk.bf16.gmra.mrb[8].mxu1 %vm1327_vm1, %v2173_v51  ;;  %v1215_v51 = vadd.f32 %v1199_v58, %v1143_v21  ;;  %v1285_v58 = vadd.f32 %v1269_v55, %v1213_v59  ;;  %v1152_v59 = vmul.f32 %v2779_v11, %v1127_v8 }
 0x2dc   : > { %1392 = vmatprep.mubr.bf16.mxu1 %v2250_v5 }
 0x2dd   : > { %v1287_v35 = vadd.f32 %v1271_v16, %v1215_v51  ;;  %v1151_v51 = vmul.f32 %v2773_v48, %v1127_v8 }
 0x2e3   : > { %2066 = vmatmul.mubr.msk.bf16.gmra.mrb[12].mxu1 %vm1327_vm1, %v2174_v53  ;;  %v1216_v53 = vadd.f32 %v1200_v20, %v1144_v22  ;;  %v1146_v20 = vmul.f32 %v2779_v11, %v1112_v24 }
 0x2e4   : > { %1402 = vmatprep.mubr.bf16.mxu1 %v2250_v5 }
 0x2eb   : > { %2067 = vmatmul.mubr.msk.bf16.gmra.mrb[16].mxu1 %vm1327_vm1, %v2175_v36 }
 0x2ec   : > { %1822 = vmatprep.mubr.bf16.mxu1 %v2250_v5 }
 0x3a6   : > { %v1374_v26 = vpop.f32.mrb[4].mxu1 }
 0x3a7   : > { %v1413_v36 = vadd.f32 %v1374_v26, %v1281_v41  ;;  %v1376_v54 = vpop.f32.mrb[5].mxu1  ;;  %v1255_v41 = vpop.permute.xlu1 %1254  ;;  %v1288_v26 = vadd.f32 %v1272_v17, %v1216_v53  ;;  %v1276_v53 = vmul.f32 %v2786_v38, %v2760_v40 }
 0x3a8   : > { %v1414_v30 = vadd.f32 %v1376_v54, %v1282_v46  ;;  %v1378_v62 = vpop.f32.mrb[6].mxu1  ;;  %v1219_v46 = vadd.f32 %v1203_v2, %v1147_v43  ;;  %v1149_v2 = vmul.f32 %v2773_v48, %v2766_v9  ;;  %v1207_v48 = vmul.f32 %v2770_v10, %v2805_v29 }
 0x3a9   : > { %v1477_v47 = vadd.f32 %v2752_v63, %v1413_v36  ;;  %v1415_v1 = vadd.f32 %v1378_v62, %v1283_v31  ;;  %v1380_v13 = vpop.f32.mrb[7].mxu1  ;;  %v1217_v36 = vadd.f32 %v1201_v0, %v1145_v57  ;;  %v1208_v0 = vmul.f32 %v2776_v33, %v2805_v29 }
 0x3aa   : > { %v1478_v52 = vadd.f32 %v2752_v63, %v1414_v30  ;;  %v1416_v60 = vadd.f32 %v1380_v13, %v1284_v39  ;;  %v1202_v63 = vmul.f32 %v2776_v33, %v2750_v34  ;;  %v1292_v57 = vadd.f32 %v1276_v53, %v1220_v56 }
 0x3ab   : > { %v1479_v18 = vadd.f32 %v2756_v3, %v1415_v1  ;;  %v1493_v7 = vmax.f32 %v1477_v47, 0.0  ;;  %v1150_v1 = vmul.f32 %v2779_v11, %v2766_v9  ;;  %v1460_v16 = vpop.permute.xlu1 %1459  ;;  %v1278_v10 = vmul.f32 %v2786_v38, %v2762_v6 }
 0x3ac   : > { %v1480_v44 = vadd.f32 %v2756_v3, %v1416_v60  ;;  %v1494_v21 = vmax.f32 %v1478_v52, 0.0  ;;  %v1274_v3 = vmul.f32 %v2786_v38, %v2758_v4  ;;  %v1218_v30 = vadd.f32 %v1202_v63, %v1146_v20 }
 0x3ad   : > { %v1495_v45 = vmax.f32 %v1479_v18, 0.0  ;;  %v1275_v4 = vmul.f32 %v2782_v12, %v2760_v40  ;;  %v1289_v52 = vadd.f32 %v1273_v61, %v1217_v36  ;;  %v1206_v60 = vmul.f32 %v2776_v33, %v2788_v49 }
 0x3ae   : > { %v1496_v22 = vmax.f32 %v1480_v44, 0.0  ;;  %v1384_v23 = vpop.f32.mrb[8].mxu1  ;;  %v1290_v18 = vadd.f32 %v1274_v3, %v1218_v30  ;;  %v1277_v49 = vmul.f32 %v2782_v12, %v2762_v6  ;;  %v1223_v33 = vadd.f32 %v1207_v48, %v1151_v51 }
 0x3af   : > { %v1517_v28 = vpack.c.bf16 %v1495_v45, %v1493_v7  ;;  %v1417_v32 = vadd.f32 %v1384_v23, %v1285_v58  ;;  %v1386_v34 = vpop.f32.mrb[9].mxu1  ;;  %v1221_v45 = vadd.f32 %v1205_v14, %v1149_v2  ;;  %v1222_v23 = vadd.f32 %v1206_v60, %v1150_v1  ;;  %v2177_v60 = vld [vmem:[%s2966_s10 + $0x8] sm:$0xff]  }
 0x3b0   : > { %v1418_v37 = vadd.f32 %v1386_v34, %v1286_v25  ;;  %v1388_v42 = vpop.f32.mrb[10].mxu1  ;;  %v1518_v24 = vpack.c.bf16 %v1496_v22, %v1494_v21  ;;  %v1465_v22 = vpop.permute.xlu0 %1464  ;;  %v1279_v29 = vmul.f32 %v2782_v12, %v1255_v41 }
 0x3b1   : > { %v1481_v54 = vadd.f32 %v1450_v27, %v1417_v32  ;;  %v1419_v31 = vadd.f32 %v1388_v42, %v1287_v35  ;;  %v1390_v55 = vpop.f32.mrb[11].mxu1  ;;  %v1280_v32 = vmul.f32 %v2786_v38, %v1255_v41  ;;  %v1470_v34 = vpop.permute.xlu1 %1469  ;;  %v1293_v42 = vadd.f32 %v1277_v49, %v1221_v45 }
 0x3b2   : > { %v1482_v62 = vadd.f32 %v1450_v27, %v1418_v37  ;;  %v1420_v39 = vadd.f32 %v1390_v55, %v1288_v26  ;;  %1605 = vmatprep.subr.bf16.mxu0 %v1518_v24  ;;  %v1295_v55 = vadd.f32 %v1279_v29, %v1223_v33 }
 0x3b3   : > { %v1483_v47 = vadd.f32 %v1455_v50, %v1419_v31  ;;  %1606 = vmatpush1.bf16.msra.mxu0 %v1517_v28  ;;  %v1497_v15 = vmax.f32 %v1481_v54, 0.0  ;;  %v1224_v28 = vadd.f32 %v1208_v0, %v1152_v59 }
 0x3b4   : > { %v1484_v13 = vadd.f32 %v1455_v50, %v1420_v39  ;;  %v1498_v17 = vmax.f32 %v1482_v62, 0.0  ;;  %v1291_v50 = vadd.f32 %v1275_v4, %v1219_v46  ;;  %v1294_v46 = vadd.f32 %v1278_v10, %v1222_v23 }
 0x3b5   : > { %v1499_v8 = vmax.f32 %v1483_v47, 0.0  ;;  %v1296_v30 = vadd.f32 %v1280_v32, %v1224_v28  ;;  %v1475_v41 = vpop.permute.xlu1 %1474 }
 0x3b6   : > { %v1500_v43 = vmax.f32 %v1484_v13, 0.0  ;;  %v1394_v40 = vpop.f32.mrb[12].mxu1 }
 0x3b7   : > { %v1519_v19 = vpack.c.bf16 %v1499_v8, %v1497_v15  ;;  %v1421_v9 = vadd.f32 %v1394_v40, %v1289_v52  ;;  %v1396_v11 = vpop.f32.mrb[13].mxu1  ;;  %v2176_v52 = vld [vmem:[%s2966_s10] sm:$0xff]  }
 0x3b8   : > { %v1422_v63 = vadd.f32 %v1396_v11, %v1290_v18  ;;  %v1398_v44 = vpop.f32.mrb[14].mxu1  ;;  %v1520_v7 = vpack.c.bf16 %v1500_v43, %v1498_v17  ;;  %v2179_v17 = vld [vmem:[%s2966_s10 + $0x18] sm:$0xff]   ;;  %v1536_v43 = vpop.permute.xlu0 %1535 }
 0x3b9   : > { %v1485_v58 = vadd.f32 %v1460_v16, %v1421_v9  ;;  %v1423_v20 = vadd.f32 %v1398_v44, %v1291_v50  ;;  %v1400_v21 = vpop.f32.mrb[15].mxu1 }
 0x3ba   : > { %v1486_v25 = vadd.f32 %v1460_v16, %v1422_v63  ;;  %v1424_v61 = vadd.f32 %v1400_v21, %v1292_v57  ;;  %1607 = vmatprep.subr.bf16.mxu0 %v1520_v7  ;;  %v2178_v16 = vld [vmem:[%s2966_s10 + $0x10] sm:$0xff]  }
 0x3bb   : > { %v1487_v27 = vadd.f32 %v1465_v22, %v1423_v20  ;;  %1608 = vmatpush1.bf16.msra.mxu0 %v1519_v19  ;;  %v1501_v3 = vmax.f32 %v1485_v58, 0.0  ;;  %v1541_v19 = vpop.permute.xlu1 %1540 }
 0x3bc   : > { %v1488_v35 = vadd.f32 %v1465_v22, %v1424_v61  ;;  %v1502_v26 = vmax.f32 %v1486_v25, 0.0  ;;  %v1546_v58 = vpop.permute.xlu0 %1545 }
 0x3bd   : > { %v1503_v37 = vmax.f32 %v1487_v27, 0.0 }
 0x3be   : > { %v1504_v6 = vmax.f32 %v1488_v35, 0.0  ;;  %v1404_v24 = vpop.f32.mrb[16].mxu1 }
 0x3bf   : > { %v1521_v36 = vpack.c.bf16 %v1503_v37, %v1501_v3  ;;  %v1425_v54 = vadd.f32 %v1404_v24, %v1293_v42  ;;  %v1406_v31 = vpop.f32.mrb[17].mxu1  ;;  %v1551_v23 = vpop.permute.xlu1 %1550 }
 0x3c0   : > { %v1426_v56 = vadd.f32 %v1406_v31, %v1294_v46  ;;  %v1408_v12 = vpop.f32.mrb[18].mxu1  ;;  %v1522_v62 = vpack.c.bf16 %v1504_v6, %v1502_v26  ;;  %v1556_v37 = vpop.permute.xlu0 %1555 }
 0x3c1   : > { %v1489_v39 = vadd.f32 %v1470_v34, %v1425_v54  ;;  %v1427_v51 = vadd.f32 %v1408_v12, %v1295_v55  ;;  %v1410_v38 = vpop.f32.mrb[19].mxu1 }
 0x3c2   : > { %v1490_v59 = vadd.f32 %v1470_v34, %v1426_v56  ;;  %v1428_v4 = vadd.f32 %v1410_v38, %v1296_v30  ;;  %1609 = vmatprep.subr.bf16.mxu0 %v1522_v62 }
 0x3c3   : > { %v1491_v47 = vadd.f32 %v1475_v41, %v1427_v51  ;;  %1610 = vmatpush1.bf16.msra.mxu0 %v1521_v36  ;;  %v1505_v2 = vmax.f32 %v1489_v39, 0.0  ;;  %v1561_v46 = vpop.permute.xlu1 %1560 }
 0x3c4   : > { %v1492_v53 = vadd.f32 %v1475_v41, %v1428_v4  ;;  %v1506_v13 = vmax.f32 %v1490_v59, 0.0  ;;  %v1566_v38 = vpop.permute.xlu0 %1565 }
 0x3c5   : > { %v1507_v1 = vmax.f32 %v1491_v47, 0.0 }
 0x3c6   : > { %v1508_v14 = vmax.f32 %v1492_v53, 0.0 }
 0x3c7   : > { %v1523_v15 = vpack.c.bf16 %v1507_v1, %v1505_v2  ;;  %v1571_v53 = vpop.permute.xlu1 %1570 }
 0x3c8   : > { %v1524_v8 = vpack.c.bf16 %v1508_v14, %v1506_v13 }
 0x3ca   : > { %1611 = vmatprep.subr.bf16.mxu0 %v1524_v8 }
 0x3cb   : > { %1612 = vmatpush1.bf16.msra.mxu0 %v1523_v15 }
 0x3ce   : > { %2072 = vmatmul.mubr.msk.bf16.vlgmr.msra.gmra.mrb[16].mxu0 %vm906_vm0, %v2176_v52 }
 0x3cf   : > { %1647 = vmatprep.mubr.bf16.mxu0 %v2250_v5 }
 0x3d6   : > { %2073 = vmatmul.mubr.msk.bf16.gmra.mrb[20].mxu0 %vm906_vm0, %v2177_v60 }
 0x3d7   : > { %1657 = vmatprep.mubr.bf16.mxu0 %v2250_v5 }
 0x3de   : > { %2074 = vmatmul.mubr.msk.bf16.gmra.mrb[24].mxu0 %vm906_vm0, %v2178_v16 }
 0x3df   : > { %1667 = vmatprep.mubr.bf16.mxu0 %v2250_v5 }
 0x3e6   : > { %2075 = vmatmul.mubr.msk.bf16.gmra.mrb[28].mxu0 %vm906_vm0, %v2179_v17 }
 0x3e7   : > { %1929 = vmatprep.mubr.bf16.mxu0 %v2250_v5 }
 0x4a1   : > { %v1639_v40 = vpop.f32.mrb[16].mxu0 }
 0x4a2   : > { %v1640_v18 = vadd.f32 %v1639_v40, %v1536_v43  ;;  %v1641_v48 = vpop.f32.mrb[17].mxu0  ;;  %v2180_v40 = vld [vmem:[%s2968_s12] sm:$0xff]  }
 0x4a3   : > { %v1642_v9 = vadd.f32 %v1641_v48, %v1536_v43  ;;  %v1643_v11 = vpop.f32.mrb[18].mxu0  ;;  %v2182_v48 = vld [vmem:[%s2968_s12 + $0x10] sm:$0xff]  }
 0x4a4   : > { %v1644_v50 = vadd.f32 %v1643_v11, %v1541_v19  ;;  %v1645_v0 = vpop.f32.mrb[19].mxu0  ;;  %v1678_v44 = vmax.f32 %v1640_v18, 0.0  ;;  %v2181_v18 = vld [vmem:[%s2968_s12 + $0x8] sm:$0xff]  }
 0x4a5   : > { %v1646_v63 = vadd.f32 %v1645_v0, %v1541_v19  ;;  %v1679_v7 = vmax.f32 %v1642_v9, 0.0  ;;  %v2183_v19 = vld [vmem:[%s2968_s12 + $0x18] sm:$0xff]   ;;  %v1721_v9 = vpop.permute.xlu0 %1720 }
 0x4a6   : > { %v1680_v57 = vmax.f32 %v1644_v50, 0.0 }
 0x4a7   : > { %v1681_v49 = vmax.f32 %v1646_v63, 0.0  ;;  %v1726_v63 = vpop.permute.xlu1 %1725 }
 0x4a8   : > { %v1702_v45 = vpack.c.bf16 %v1680_v57, %v1678_v44 }
 0x4a9   : > { %v1703_v20 = vpack.c.bf16 %v1681_v49, %v1679_v7  ;;  %v1649_v21 = vpop.f32.mrb[20].mxu0 }
 0x4aa   : > { %v1650_v10 = vadd.f32 %v1649_v21, %v1546_v58  ;;  %v1651_v22 = vpop.f32.mrb[21].mxu0 }
 0x4ab   : > { %v1652_v25 = vadd.f32 %v1651_v22, %v1546_v58  ;;  %v1653_v61 = vpop.f32.mrb[22].mxu0  ;;  %1790 = vmatprep.subr.bf16.mxu1 %v1703_v20  ;;  %v1731_v22 = vpop.permute.xlu0 %1730 }
 0x4ac   : > { %v1654_v33 = vadd.f32 %v1653_v61, %v1551_v23  ;;  %v1655_v29 = vpop.f32.mrb[23].mxu0  ;;  %1791 = vmatpush1.bf16.msra.mxu1 %v1702_v45  ;;  %v1682_v28 = vmax.f32 %v1650_v10, 0.0 }
 0x4ad   : > { %v1656_v27 = vadd.f32 %v1655_v29, %v1551_v23  ;;  %v1683_v34 = vmax.f32 %v1652_v25, 0.0  ;;  %v1736_v29 = vpop.permute.xlu1 %1735 }
 0x4ae   : > { %v1684_v32 = vmax.f32 %v1654_v33, 0.0 }
 0x4af   : > { %v1685_v35 = vmax.f32 %v1656_v27, 0.0 }
 0x4b0   : > { %v1704_v3 = vpack.c.bf16 %v1684_v32, %v1682_v28 }
 0x4b1   : > { %v1705_v42 = vpack.c.bf16 %v1685_v35, %v1683_v34  ;;  %v1659_v26 = vpop.f32.mrb[24].mxu0 }
 0x4b2   : > { %v1660_v6 = vadd.f32 %v1659_v26, %v1556_v37  ;;  %v1661_v24 = vpop.f32.mrb[25].mxu0 }
 0x4b3   : > { %v1662_v36 = vadd.f32 %v1661_v24, %v1556_v37  ;;  %v1663_v54 = vpop.f32.mrb[26].mxu0  ;;  %1792 = vmatprep.subr.bf16.mxu1 %v1705_v42  ;;  %v1741_v24 = vpop.permute.xlu0 %1740 }
 0x4b4   : > { %v1664_v31 = vadd.f32 %v1663_v54, %v1561_v46  ;;  %v1665_v55 = vpop.f32.mrb[27].mxu0  ;;  %1793 = vmatpush1.bf16.msra.mxu1 %v1704_v3  ;;  %v1686_v12 = vmax.f32 %v1660_v6, 0.0 }
 0x4b5   : > { %v1666_v56 = vadd.f32 %v1665_v55, %v1561_v46  ;;  %v1687_v62 = vmax.f32 %v1662_v36, 0.0  ;;  %v1746_v55 = vpop.permute.xlu1 %1745 }
 0x4b6   : > { %v1688_v30 = vmax.f32 %v1664_v31, 0.0 }
 0x4b7   : > { %v1689_v39 = vmax.f32 %v1666_v56, 0.0 }
 0x4b8   : > { %v1706_v51 = vpack.c.bf16 %v1688_v30, %v1686_v12 }
 0x4b9   : > { %v1707_v41 = vpack.c.bf16 %v1689_v39, %v1687_v62  ;;  %v1669_v59 = vpop.f32.mrb[28].mxu0 }
 0x4ba   : > { %v1670_v4 = vadd.f32 %v1669_v59, %v1566_v38  ;;  %v1671_v47 = vpop.f32.mrb[29].mxu0 }
 0x4bb   : > { %v1672_v2 = vadd.f32 %v1671_v47, %v1566_v38  ;;  %v1673_v1 = vpop.f32.mrb[30].mxu0  ;;  %1794 = vmatprep.subr.bf16.mxu1 %v1707_v41  ;;  %v1751_v47 = vpop.permute.xlu0 %1750 }
 0x4bc   : > { %v1674_v13 = vadd.f32 %v1673_v1, %v1571_v53  ;;  %v1675_v14 = vpop.f32.mrb[31].mxu0  ;;  %1795 = vmatpush1.bf16.msra.mxu1 %v1706_v51  ;;  %v1690_v8 = vmax.f32 %v1670_v4, 0.0 }
 0x4bd   : > { %v1676_v15 = vadd.f32 %v1675_v14, %v1571_v53  ;;  %v1691_v60 = vmax.f32 %v1672_v2, 0.0  ;;  %v1756_v14 = vpop.permute.xlu1 %1755 }
 0x4be   : > { %v1692_v52 = vmax.f32 %v1674_v13, 0.0 }
 0x4bf   : > { %v1693_v16 = vmax.f32 %v1676_v15, 0.0 }
 0x4c0   : > { %v1708_v17 = vpack.c.bf16 %v1692_v52, %v1690_v8 }
 0x4c1   : > { %v1709_v43 = vpack.c.bf16 %v1693_v16, %v1691_v60 }
 0x4c3   : > { %1796 = vmatprep.subr.bf16.mxu1 %v1709_v43 }
 0x4c4   : > { %1797 = vmatpush1.bf16.msra.mxu1 %v1708_v17 }
 0x4c7   : > { %2080 = vmatmul.mubr.msk.bf16.vlgmr.msra.gmra.mrb[20].mxu1 %vm906_vm0, %v2180_v40 }
 0x4c8   : > { %1832 = vmatprep.mubr.bf16.mxu1 %v2250_v5 }
 0x4cf   : > { %2081 = vmatmul.mubr.msk.bf16.gmra.mrb[24].mxu1 %vm906_vm0, %v2181_v18 }
 0x4d0   : > { %1842 = vmatprep.mubr.bf16.mxu1 %v2250_v5 }
 0x4d7   : > { %2082 = vmatmul.mubr.msk.bf16.gmra.mrb[28].mxu1 %vm906_vm0, %v2182_v48 }
 0x4d8   : > { %1852 = vmatprep.mubr.bf16.mxu1 %v2250_v5 }
 0x4df   : > { %2083 = vmatmul.mubr.msk.bf16.gmra.mrb[32].mxu1 %vm906_vm0, %v2183_v19 }
 0x59a   : > { %v1824_v11 = vpop.f32.mrb[20].mxu1 }
 0x59b   : > { %v1825_v50 = vadd.f32 %v1824_v11, %v1721_v9  ;;  %v1826_v0 = vpop.f32.mrb[21].mxu1  ;;  %v1892_v11 = vpop.permute.xlu0 %1891 }
 0x59c   : > { %v1827_v44 = vadd.f32 %v1826_v0, %v1721_v9  ;;  %v1828_v57 = vpop.f32.mrb[22].mxu1  ;;  %v1879_v9 = vld [vmem:[%s2970_s14] sm:$0x3] }
 0x59d   : > { %v1829_v7 = vadd.f32 %v1828_v57, %v1726_v63  ;;  %v1830_v49 = vpop.f32.mrb[23].mxu1  ;;  %v1863_v58 = vmax.f32 %v1825_v50, 0.0 }
 0x59e   : > { %v1831_v45 = vadd.f32 %v1830_v49, %v1726_v63  ;;  %v1864_v21 = vmax.f32 %v1827_v44, 0.0 }
 0x59f   : > { %v1865_v20 = vmax.f32 %v1829_v7, 0.0 }
 0x5a0   : > { %v1866_v5 = vmax.f32 %v1831_v45, 0.0 }
 0x5a1   : > { %v1880_v10 = vpack.c.bf16 %v1865_v20, %v1863_v58 }
 0x5a2   : > { %v1881_v23 = vpack.c.bf16 %v1866_v5, %v1864_v21  ;;  %v1834_v25 = vpop.f32.mrb[24].mxu1 }
 0x5a3   : > { %v1835_v61 = vadd.f32 %v1834_v25, %v1731_v22  ;;  %v1836_v33 = vpop.f32.mrb[25].mxu1 }
 0x5a4   : > { %v1837_v27 = vadd.f32 %v1836_v33, %v1731_v22  ;;  %v1838_v28 = vpop.f32.mrb[26].mxu1  ;;  %1897 = vmatprep.subr.bf16.mxu0 %v1881_v23 }
 0x5a5   : > { %v1839_v32 = vadd.f32 %v1838_v28, %v1736_v29  ;;  %v1840_v34 = vpop.f32.mrb[27].mxu1  ;;  %1898 = vmatpush1.bf16.msra.mxu0 %v1880_v10  ;;  %v1867_v3 = vmax.f32 %v1835_v61, 0.0 }
 0x5a6   : > { %v1841_v35 = vadd.f32 %v1840_v34, %v1736_v29  ;;  %v1868_v42 = vmax.f32 %v1837_v27, 0.0 }
 0x5a7   : > { %v1869_v37 = vmax.f32 %v1839_v32, 0.0 }
 0x5a8   : > { %v1870_v26 = vmax.f32 %v1841_v35, 0.0 }
 0x5a9   : > { %v1882_v6 = vpack.c.bf16 %v1869_v37, %v1867_v3 }
 0x5aa   : > { %v1883_v46 = vpack.c.bf16 %v1870_v26, %v1868_v42  ;;  %v1844_v36 = vpop.f32.mrb[28].mxu1 }
 0x5ab   : > { %v1845_v54 = vadd.f32 %v1844_v36, %v1741_v24  ;;  %v1846_v31 = vpop.f32.mrb[29].mxu1 }
 0x5ac   : > { %v1847_v56 = vadd.f32 %v1846_v31, %v1741_v24  ;;  %v1848_v12 = vpop.f32.mrb[30].mxu1  ;;  %1899 = vmatprep.subr.bf16.mxu0 %v1883_v46 }
 0x5ad   : > { %v1849_v30 = vadd.f32 %v1848_v12, %v1746_v55  ;;  %v1850_v62 = vpop.f32.mrb[31].mxu1  ;;  %1900 = vmatpush1.bf16.msra.mxu0 %v1882_v6  ;;  %v1871_v51 = vmax.f32 %v1845_v54, 0.0 }
 0x5ae   : > { %v1851_v39 = vadd.f32 %v1850_v62, %v1746_v55  ;;  %v1872_v41 = vmax.f32 %v1847_v56, 0.0 }
 0x5af   : > { %v1873_v38 = vmax.f32 %v1849_v30, 0.0 }
 0x5b0   : > { %v1874_v59 = vmax.f32 %v1851_v39, 0.0 }
 0x5b1   : > { %v1884_v4 = vpack.c.bf16 %v1873_v38, %v1871_v51 }
 0x5b2   : > { %v1885_v53 = vpack.c.bf16 %v1874_v59, %v1872_v41  ;;  %v1854_v2 = vpop.f32.mrb[32].mxu1 }
 0x5b3   : > { %v1855_v1 = vadd.f32 %v1854_v2, %v1751_v47  ;;  %v1856_v13 = vpop.f32.mrb[33].mxu1 }
 0x5b4   : > { %v1857_v15 = vadd.f32 %v1856_v13, %v1751_v47  ;;  %v1858_v8 = vpop.f32.mrb[34].mxu1  ;;  %1901 = vmatprep.subr.bf16.mxu0 %v1885_v53 }
 0x5b5   : > { %v1859_v52 = vadd.f32 %v1858_v8, %v1756_v14  ;;  %v1860_v60 = vpop.f32.mrb[35].mxu1  ;;  %1902 = vmatpush1.bf16.msra.mxu0 %v1884_v4  ;;  %v1875_v17 = vmax.f32 %v1855_v1, 0.0 }
 0x5b6   : > { %v1861_v16 = vadd.f32 %v1860_v60, %v1756_v14  ;;  %v1876_v40 = vmax.f32 %v1857_v15, 0.0 }
 0x5b7   : > { %v1877_v43 = vmax.f32 %v1859_v52, 0.0 }
 0x5b8   : > { %v1878_v18 = vmax.f32 %v1861_v16, 0.0 }
 0x5b9   : > { %v1886_v48 = vpack.c.bf16 %v1877_v43, %v1875_v17 }
 0x5ba   : > { %v1887_v19 = vpack.c.bf16 %v1878_v18, %v1876_v40 }
 0x5bc   : > { %1903 = vmatprep.subr.bf16.mxu0 %v1887_v19 }
 0x5bd   : > { %1904 = vmatpush1.bf16.msra.mxu0 %v1886_v48 }
 0x5c0   : > { %2084 = vmatmul.mubr.msk.bf16.vlgmr.msra.gmra.mrb[32].mxu0 %vm906_vm0, %v1879_v9 }
 0x693   : > { %v1931_v50 = vpop.f32.mrb[32].mxu0 }
 0x694   : > { %v1932_v0 = vadd.f32 %v1931_v50, %v1892_v11  ;;  %v1933_v63 = vpop.f32.mrb[33].mxu0 }
 0x695   : > { %v1934_v44 = vadd.f32 %v1933_v63, %v1892_v11  ;;  %v1935_v57 = vpop.f32.mrb[34].mxu0 }
 0x696   : > { %v1936_v7 = vpop.f32.mrb[35].mxu0 }
 0x697   : > { %v1940_v49 = vcombine.low %v1932_v0, %v1934_v44 }
 0x699   : > { %1942 = vst [vmem:[%s2731_s19] sm:$0x77] %v1940_v49 }
 0x69a   : > { %2197 = shalt.err (!%p2194_p3)
}
 0x69b   : > { %s2198_s26 = scalar_lea.hbm %s2911_s2, 128  ;;  %s2202_s1 = scalar_lea.hbm %s2972_s16, 512 }
 0x69c   : > { %p2199_p4 = scmp.ne.s32.totalorder %s2911_s2, %s2198_s26  ;;  %p2203_p9 = scmp.lt.u32.totalorder %s2911_s2, %s2972_s16 }
 0x69d   : > { %p2204_p10 = scmp.lt.u32.totalorder %s2202_s1, %s2198_s26  ;;  %p2206_p12 = scmp.lt.u32.totalorder %s2198_s26, %s2911_s2 }
 0x69e   : > { %p2200_p7 = pnand %p2199_p4, %p2376_p5 }
 0x69f   : > { %p2205_p11 = por %p2204_p10, %p2203_p9 }
 0x6a0   : > { %p2201_p8 = pneg %p2200_p7 }
 0x6a1   : > { %p2207_p13 = por %p2206_p12, %p2205_p11 }
 0x6a3   : > { %p2208_p0 = pnand %p2207_p13, %p2201_p8 }
 0x6a5   : > { %2211 = shalt.err (!%p2208_p0)
}
 0x6a6   : > { %2092 = dma.vmem_to_hbm [thread:$0]  (%p2376_p5), %s2913_s18, 128, %s2911_s2, %s1970_s28  }
 0x6a7 PF: > { %p2098_p1 = scmp.ge.s32.totalorder %s2246_s24, 2  ;;  %s1996_s3 = sand.u32 1, %s2234_s21  }
 0x6a8   : > { %s1997_s29 = scalar_lea.sflag [#allocation3], %s1996_s3 }
 0x6a9   : > { %p2095_p2 = pnand %p2098_p1, %p2380_p6 }
 0x6ab   : > { %2229 = dma.done.wait (!%p2095_p2), %s1997_s29, 128  }
 0x6ac   : > { %2231 = vsyncadd (!%p2095_p2), %s1997_s29, 4294967168  ;;  %s2986_s23 = sld [smem:[#allocation5_spill]]  ;;  %s2987_s26 = sld [smem:[#allocation6_spill]] }
 0x6ad   : > { %p26_p3 = scmp.ge.s32.totalorder %s2363_s27, 6   ;;  %s2988_s21 = smov %s2238_s22 }
 0x6ae   : > { %s2991_s24 = smov %s2363_s27 }
 0x6af   :  { %28 = sbr.rel (!%p26_p3) target bundleno = 8 (0x8), region = 120 }
 0x6b2   : > { %s2989_s22 = smov %s2986_s23  ;;  %s2990_s23 = smov %s2987_s26 }
 0x6b6   :  { %2002 = vsyncpa [#allocation3], 1 }
 0x6b7   :  { %2004 = vsyncpa [#allocation3 + $0x1], 1 }

</bundles_post_ra>
